<compile_context>
chip_gen: v6e
topology: v6e:2x2x1
jax: 0.10.0
libtpu: 0.0.40
codegen_flags: <defaults>
</compile_context>

<pallas_src>
import jax
import jax.numpy as jnp
import numpy as np
from jax import lax
from jax.experimental import pallas as pl
from jax.experimental.pallas import tpu as pltpu

DOC_DIM = 32              # document_encoder_dim
D2 = DOC_DIM * 2          # bidirectional doc vector size = 64 (gate width)
GATE_HID = 512            # RepresentationCombiner2 hidden size
L1 = 128                  # linear_layer1_dim
L2 = 64                   # linear_layer2_dim
OUT_DIM = 71              # output_dim
OUT_PAD = 128             # lane-dense padded classifier width
BN_EPS = 1e-5
LEAKY_SLOPE = 0.01
NEG_BIG = -1e30           # pad-logit bias -> softmax prob exactly 0 (must stay f32)
MAX_TB = 256              # batch tile (rows); VMEM-safe on v5e/v6e/v7x


def _leaky_relu(x):
    return jnp.where(x >= 0, x, LEAKY_SLOPE * x)


def integrated_kernel(nv_ref, rv_ref,
                      wn1_ref, bn1_ref, wn2_ref, bn2_ref,
                      wr1_ref, br1_ref, wr2_ref, br2_ref,
                      wgn_ref, wgr_ref,
                      wf1_ref, bf1_ref, wf2_ref, bf2_ref, wf3_ref, bf3_ref,
                      out_ref):
    f32 = jnp.float32
    nv = nv_ref[...]                                   # (TB, 64)
    rv = rv_ref[...]                                   # (TB, 64)

    # ---- RepresentationCombiner2('gate'): two branch MLPs + control gate ----
    h_plot = jnp.tanh(
        jnp.dot(jnp.maximum(jnp.dot(nv, wn1_ref[...], preferred_element_type=f32)
                            + bn1_ref[...], 0.0),
                wn2_ref[...], preferred_element_type=f32) + bn2_ref[...])   # (TB, 64)
    h_rb = jnp.tanh(
        jnp.dot(jnp.maximum(jnp.dot(rv, wr1_ref[...], preferred_element_type=f32)
                            + br1_ref[...], 0.0),
                wr2_ref[...], preferred_element_type=f32) + br2_ref[...])   # (TB, 64)

    # control gate: sigmoid(cat([nv, rv]) @ w_g) == sigmoid(nv@Wg_n + rv@Wg_r)
    z = jax.nn.sigmoid(
        jnp.dot(nv, wgn_ref[...], preferred_element_type=f32)
        + jnp.dot(rv, wgr_ref[...], preferred_element_type=f32))            # (TB, 64)
    h = z * h_plot + (1.0 - z) * h_rb                                       # (TB, 64)

    # gate statistics (pre-scaled; packed into the last two pad lanes below)
    count = jnp.sum(jnp.where(z > 0.5, 1.0, 0.0), axis=-1, keepdims=True)   # (TB, 1)
    plot_sig = count * (100.0 / float(D2))
    rb_sig = (float(D2) - count) * (100.0 / float(D2))

    # ---- fc_out (eval mode; BN1 folded into wf2, BN2 folded into wf3) ----
    x = _leaky_relu(jnp.dot(h, wf1_ref[...], preferred_element_type=f32)
                    + bf1_ref[...])                                         # (TB, 128)
    x = _leaky_relu(jnp.dot(x, wf2_ref[...], preferred_element_type=f32)
                    + bf2_ref[...])                                         # (TB, 128), lanes 64+ are 0
    logits = (jnp.dot(x, wf3_ref[...], preferred_element_type=f32)
              + bf3_ref[...])                                               # (TB, 128), pad lanes -1e30

    # softmax over dim=1 (pad lanes contribute exactly 0)
    m = jnp.max(logits, axis=-1, keepdims=True)
    e = jnp.exp(logits - m)
    probs = e * pl.reciprocal(jnp.sum(e, axis=-1, keepdims=True), approx=False)

    # pack plot/rb gate stats into the last two (padded) lanes -> single
    # lane-dense (TB, 128) unmasked store.
    lane = jax.lax.broadcasted_iota(jnp.int32, probs.shape, 1)
    out_ref[...] = jnp.where(lane == OUT_PAD - 2, plot_sig,
                             jnp.where(lane == OUT_PAD - 1, rb_sig, probs))


# -------------------- parameter construction / preprocessing --------------------

def make_params(key):
    """Raw parameters in PyTorch layout transposed: weights (in, out), 1-D params (1, N)."""
    ks = jax.random.split(key, 23)
    s = 0.05

    def w(k, shp):
        return jax.random.normal(k, shp, dtype=jnp.float32) * s

    return dict(
        # RepresentationCombiner2('gate', 64)
        w_n1=w(ks[0], (D2, GATE_HID)), b_n1=w(ks[1], (1, GATE_HID)),
        w_n2=w(ks[2], (GATE_HID, D2)), b_n2=w(ks[3], (1, D2)),
        w_r1=w(ks[4], (D2, GATE_HID)), b_r1=w(ks[5], (1, GATE_HID)),
        w_r2=w(ks[6], (GATE_HID, D2)), b_r2=w(ks[7], (1, D2)),
        w_g=w(ks[8], (2 * D2, D2)),
        # fc_out: Linear 64->128, BN(128), Linear 128->64, BN(64), Linear 64->71
        wf1=w(ks[9], (D2, L1)), bf1=w(ks[10], (1, L1)),
        g1=1.0 + 0.05 * jax.random.normal(ks[11], (1, L1), jnp.float32),
        be1=0.05 * jax.random.normal(ks[12], (1, L1), jnp.float32),
        m1=0.05 * jax.random.normal(ks[13], (1, L1), jnp.float32),
        v1=1.0 + 0.1 * jnp.abs(jax.random.normal(ks[14], (1, L1), jnp.float32)),
        wf2=w(ks[15], (L1, L2)), bf2=w(ks[16], (1, L2)),
        g2=1.0 + 0.05 * jax.random.normal(ks[17], (1, L2), jnp.float32),
        be2=0.05 * jax.random.normal(ks[18], (1, L2), jnp.float32),
        m2=0.05 * jax.random.normal(ks[19], (1, L2), jnp.float32),
        v2=1.0 + 0.1 * jnp.abs(jax.random.normal(ks[20], (1, L2), jnp.float32)),
        wf3=w(ks[21], (L2, OUT_DIM)), bf3=w(ks[22], (1, OUT_DIM)),
    )


def prepare_params(p):
    """One-time wrapper-side preprocessing: gate split, BN folding, lane padding.

    All outputs stay f32 (no bf16) so the kernel matches the f32 reference and
    the MXU sees no in-kernel dtype converts.
    """
    # control gate split so the kernel never needs an in-kernel concat
    wgn = p["w_g"][:D2, :]                                               # (64, 64)
    wgr = p["w_g"][D2:, :]                                               # (64, 64)

    # fold eval-mode BatchNorms into the following Linears
    a1 = p["g1"] * lax.rsqrt(p["v1"] + BN_EPS)
    c1 = p["be1"] - p["m1"] * a1
    wf2_fold = a1.reshape(-1, 1) * p["wf2"]                              # (128, 64)
    bf2_fold = p["bf2"] + c1 @ p["wf2"]                                  # (1, 64)
    a2 = p["g2"] * lax.rsqrt(p["v2"] + BN_EPS)
    c2 = p["be2"] - p["m2"] * a2
    wf3_fold = a2.reshape(-1, 1) * p["wf3"]                              # (64, 71)
    bf3_fold = p["bf3"] + c2 @ p["wf3"]                                  # (1, 71)

    # lane padding: wf2 output cols -> 128 (zeros, bias 0 -> leaky(0)=0),
    # wf3 K -> 128 (zero rows) and N -> 128 with pad bias -1e30 (prob = 0).
    wf2_pad = jnp.zeros((L1, L1), jnp.float32).at[:, :L2].set(wf2_fold)
    bf2_pad = jnp.zeros((1, L1), jnp.float32).at[:, :L2].set(bf2_fold)
    wf3_pad = jnp.zeros((L1, OUT_PAD), jnp.float32).at[:L2, :OUT_DIM].set(wf3_fold)
    bf3_pad = jnp.full((1, OUT_PAD), NEG_BIG, jnp.float32).at[:, :OUT_DIM].set(bf3_fold)

    return dict(
        wn1=p["w_n1"], bn1=p["b_n1"], wn2=p["w_n2"], bn2=p["b_n2"],
        wr1=p["w_r1"], br1=p["b_r1"], wr2=p["w_r2"], br2=p["b_r2"],
        wgn=wgn, wgr=wgr,
        wf1=p["wf1"], bf1=p["bf1"],
        wf2=wf2_pad, bf2=bf2_pad, wf3=wf3_pad, bf3=bf3_pad,
    )


PREP_ORDER = ["wn1", "bn1", "wn2", "bn2", "wr1", "br1", "wr2", "br2",
              "wgn", "wgr", "wf1", "bf1", "wf2", "bf2", "wf3", "bf3"]


def _round_up(x, m):
    return (x + m - 1) // m * m


@jax.jit
def integrated_forward(narrative_vector, review_vector, prep):
    B = narrative_vector.shape[0]
    TB = min(MAX_TB, _round_up(B, 8))            # batch tile (multiple of 8 sublanes)
    B_pad = _round_up(B, TB)

    nv, rv = narrative_vector, review_vector
    if B_pad != B:
        nv = jnp.pad(nv, ((0, B_pad - B), (0, 0)))
        rv = jnp.pad(rv, ((0, B_pad - B), (0, 0)))

    weights = [prep[n] for n in PREP_ORDER]
    grid = (B_pad // TB,)

    # activations / output: blocked over rows.  Weights: full-array blocks
    # with constant index maps -> DMA'd once, VMEM-resident across all steps.
    act_spec = lambda width: pl.BlockSpec((TB, width), lambda i: (i, 0))
    w_specs = [pl.BlockSpec(w.shape, lambda i: (0, 0)) for w in weights]

    # advisory cost estimate so XLA schedules surrounding ops around this call
    flops = 2 * B_pad * (2 * D2 * GATE_HID + 2 * GATE_HID * D2 + 2 * D2 * D2
                         + D2 * L1 + L1 * L1 + L1 * OUT_PAD)
    transcendentals = B_pad * (2 * D2 + D2 + OUT_PAD)          # tanh + sigmoid + exp
    w_bytes = sum(int(np.prod(w.shape)) * 4 for w in weights)
    bytes_accessed = w_bytes + B_pad * (2 * D2 + OUT_PAD) * 4

    out128 = pl.pallas_call(
        integrated_kernel,
        out_shape=jax.ShapeDtypeStruct((B_pad, OUT_PAD), jnp.float32),
        grid=grid,
        in_specs=[act_spec(D2), act_spec(D2)] + w_specs,
        out_specs=pl.BlockSpec((TB, OUT_PAD), lambda i: (i, 0)),
        compiler_params=pltpu.CompilerParams(
            dimension_semantics=("parallel",)),   # v7x: shard batch over both TCs
        cost_estimate=pl.CostEstimate(
            flops=flops, transcendentals=transcendentals,
            bytes_accessed=bytes_accessed),
    )(nv, rv, *weights)

    out = out128[:B, :OUT_DIM]                        # softmax probabilities
    gate_weights = out128[:B, OUT_PAD - 2:OUT_PAD]    # [plot_sig%, rb_sig%] packed in pad lanes

    return {
        "out": out,
        "gate_weights": gate_weights,
        "plot_sent_attn": None,
        "plot_doc_attn": None,
        "review_body_sent_attn": None,
        "review_body_doc_attn": None,
        "review_title_sent_attn": jnp.zeros((0,), jnp.float32),
        "review_title_doc_attn": jnp.zeros((0,), jnp.float32),
        "sent_to_tag_weighted": None,
    }


# -------------------- pure-JAX reference (original module structure) --------------------

def reference_forward(nv, rv, p):
    HI = jax.lax.Precision.HIGHEST

    def dot(a, b):
        return jnp.dot(a, b, precision=HI)

    def leaky(x):
        return jnp.where(x >= 0, x, LEAKY_SLOPE * x)

    h_plot = jnp.tanh(dot(jnp.maximum(dot(nv, p["w_n1"]) + p["b_n1"], 0.0),
                          p["w_n2"]) + p["b_n2"])
    h_rb = jnp.tanh(dot(jnp.maximum(dot(rv, p["w_r1"]) + p["b_r1"], 0.0),
                        p["w_r2"]) + p["b_r2"])
    z = jax.nn.sigmoid(dot(jnp.concatenate([nv, rv], -1), p["w_g"]))
    h = z * h_plot + (1.0 - z) * h_rb
    count = jnp.sum((z > 0.5).astype(jnp.float32), -1, keepdims=True)
    gate_weights = jnp.concatenate(
        [count / float(D2) * 100.0, (float(D2) - count) / float(D2) * 100.0], -1)

    x = leaky(dot(h, p["wf1"]) + p["bf1"])
    x = (x - p["m1"]) * lax.rsqrt(p["v1"] + BN_EPS) * p["g1"] + p["be1"]
    x = leaky(dot(x, p["wf2"]) + p["bf2"])
    x = (x - p["m2"]) * lax.rsqrt(p["v2"] + BN_EPS) * p["g2"] + p["be2"]
    logits = dot(x, p["wf3"]) + p["bf3"]
    return jax.nn.softmax(logits, axis=1), gate_weights


if __name__ == "__main__":
    key = jax.random.PRNGKey(0)
    k_nv, k_rv, k_params = jax.random.split(key, 3)

    B = 8  # batch size
    narrative_vector = jax.random.normal(k_nv, (B, D2), dtype=jnp.float32)
    review_vector = jax.random.normal(k_rv, (B, D2), dtype=jnp.float32)
    params = make_params(k_params)
    prep = prepare_params(params)   # one-time wrapper-side preprocessing

    out_dict = integrated_forward(narrative_vector, review_vector, prep)
    jax.block_until_ready(out_dict["out"])
    jax.block_until_ready(out_dict["gate_weights"])

    ref_out, ref_gate = reference_forward(narrative_vector, review_vector, params)
    np.testing.assert_allclose(np.asarray(out_dict["out"]), np.asarray(ref_out),
                               rtol=1e-5, atol=1e-5)
    np.testing.assert_allclose(np.asarray(out_dict["gate_weights"]), np.asarray(ref_gate),
                               rtol=1e-5, atol=1e-5)
    # softmax rows sum to 1
    np.testing.assert_allclose(np.asarray(out_dict["out"]).sum(-1), np.ones(B),
                               rtol=1e-5, atol=1e-5)

    print("KERNEL_OK")
</pallas_src>

<mosaic_0001>
module attributes {stable_mosaic.version = 11 : i64} {
  func.func @integrated_kernel(%arg0: i32, %arg1: memref<8x64xf32, #tpu.memory_space<vmem>>, %arg2: memref<8x64xf32, #tpu.memory_space<vmem>>, %arg3: memref<64x512xf32, #tpu.memory_space<vmem>>, %arg4: memref<1x512xf32, #tpu.memory_space<vmem>>, %arg5: memref<512x64xf32, #tpu.memory_space<vmem>>, %arg6: memref<1x64xf32, #tpu.memory_space<vmem>>, %arg7: memref<64x512xf32, #tpu.memory_space<vmem>>, %arg8: memref<1x512xf32, #tpu.memory_space<vmem>>, %arg9: memref<512x64xf32, #tpu.memory_space<vmem>>, %arg10: memref<1x64xf32, #tpu.memory_space<vmem>>, %arg11: memref<64x64xf32, #tpu.memory_space<vmem>>, %arg12: memref<64x64xf32, #tpu.memory_space<vmem>>, %arg13: memref<64x128xf32, #tpu.memory_space<vmem>>, %arg14: memref<1x128xf32, #tpu.memory_space<vmem>>, %arg15: memref<128x128xf32, #tpu.memory_space<vmem>>, %arg16: memref<1x128xf32, #tpu.memory_space<vmem>>, %arg17: memref<128x128xf32, #tpu.memory_space<vmem>>, %arg18: memref<1x128xf32, #tpu.memory_space<vmem>>, %arg19: memref<8x128xf32, #tpu.memory_space<vmem>>) attributes {dimension_semantics = [#tpu.dimension_semantics<parallel>], iteration_bounds = array<i64: 1>, scalar_prefetch = 0 : i64, scratch_operands = 0 : i64, tpu.core_type = #tpu.core_type<tc>, window_params = [{transform_indices = @transform_0, window_bounds = array<i64: 8, 64>}, {transform_indices = @transform_1, window_bounds = array<i64: 8, 64>}, {pipeline_mode = #tpu.pipeline_mode<synchronous>, transform_indices = @transform_2, window_bounds = array<i64: 64, 512>}, {pipeline_mode = #tpu.pipeline_mode<synchronous>, transform_indices = @transform_3, window_bounds = array<i64: 1, 512>}, {pipeline_mode = #tpu.pipeline_mode<synchronous>, transform_indices = @transform_4, window_bounds = array<i64: 512, 64>}, {pipeline_mode = #tpu.pipeline_mode<synchronous>, transform_indices = @transform_5, window_bounds = array<i64: 1, 64>}, {pipeline_mode = #tpu.pipeline_mode<synchronous>, transform_indices = @transform_6, window_bounds = array<i64: 64, 512>}, {pipeline_mode = #tpu.pipeline_mode<synchronous>, transform_indices = @transform_7, window_bounds = array<i64: 1, 512>}, {pipeline_mode = #tpu.pipeline_mode<synchronous>, transform_indices = @transform_8, window_bounds = array<i64: 512, 64>}, {pipeline_mode = #tpu.pipeline_mode<synchronous>, transform_indices = @transform_9, window_bounds = array<i64: 1, 64>}, {pipeline_mode = #tpu.pipeline_mode<synchronous>, transform_indices = @transform_10, window_bounds = array<i64: 64, 64>}, {pipeline_mode = #tpu.pipeline_mode<synchronous>, transform_indices = @transform_11, window_bounds = array<i64: 64, 64>}, {pipeline_mode = #tpu.pipeline_mode<synchronous>, transform_indices = @transform_12, window_bounds = array<i64: 64, 128>}, {pipeline_mode = #tpu.pipeline_mode<synchronous>, transform_indices = @transform_13, window_bounds = array<i64: 1, 128>}, {pipeline_mode = #tpu.pipeline_mode<synchronous>, transform_indices = @transform_14, window_bounds = array<i64: 128, 128>}, {pipeline_mode = #tpu.pipeline_mode<synchronous>, transform_indices = @transform_15, window_bounds = array<i64: 1, 128>}, {pipeline_mode = #tpu.pipeline_mode<synchronous>, transform_indices = @transform_16, window_bounds = array<i64: 128, 128>}, {pipeline_mode = #tpu.pipeline_mode<synchronous>, transform_indices = @transform_17, window_bounds = array<i64: 1, 128>}, {transform_indices = @transform_18, window_bounds = array<i64: 8, 128>}]} {
    %c0 = arith.constant 0 : index
    %c0_0 = arith.constant 0 : index
    %0 = vector.load %arg1[%c0, %c0_0] : memref<8x64xf32, #tpu.memory_space<vmem>>, vector<8x64xf32>
    %c0_1 = arith.constant 0 : index
    %c0_2 = arith.constant 0 : index
    %1 = vector.load %arg2[%c0_1, %c0_2] : memref<8x64xf32, #tpu.memory_space<vmem>>, vector<8x64xf32>
    %c0_3 = arith.constant 0 : index
    %c0_4 = arith.constant 0 : index
    %2 = vector.load %arg3[%c0_3, %c0_4] : memref<64x512xf32, #tpu.memory_space<vmem>>, vector<64x512xf32>
    %cst = arith.constant dense<0.000000e+00> : vector<8x512xf32>
    %3 = tpu.matmul %0, %2, %cst {dimension_numbers = #tpu.dot_dimension_numbers<[1], [0], [0], [1], [0, 0, 1, 1], [], []>} : vector<8x64xf32>, vector<64x512xf32>, vector<8x512xf32> -> vector<8x512xf32>
    %c0_5 = arith.constant 0 : index
    %c0_6 = arith.constant 0 : index
    %4 = vector.load %arg4[%c0_5, %c0_6] : memref<1x512xf32, #tpu.memory_space<vmem>>, vector<1x512xf32>
    %5 = vector.broadcast %4 : vector<1x512xf32> to vector<8x512xf32>
    %6 = arith.addf %3, %5 : vector<8x512xf32>
    %cst_7 = arith.constant 0.000000e+00 : f32
    %7 = vector.broadcast %cst_7 : f32 to vector<8x512xf32>
    %8 = arith.maximumf %6, %7 : vector<8x512xf32>
    %c0_8 = arith.constant 0 : index
    %c0_9 = arith.constant 0 : index
    %9 = vector.load %arg5[%c0_8, %c0_9] : memref<512x64xf32, #tpu.memory_space<vmem>>, vector<512x64xf32>
    %cst_10 = arith.constant dense<0.000000e+00> : vector<8x64xf32>
    %10 = tpu.matmul %8, %9, %cst_10 {dimension_numbers = #tpu.dot_dimension_numbers<[1], [0], [0], [1], [0, 0, 1, 1], [], []>} : vector<8x512xf32>, vector<512x64xf32>, vector<8x64xf32> -> vector<8x64xf32>
    %c0_11 = arith.constant 0 : index
    %c0_12 = arith.constant 0 : index
    %11 = vector.load %arg6[%c0_11, %c0_12] : memref<1x64xf32, #tpu.memory_space<vmem>>, vector<1x64xf32>
    %12 = vector.broadcast %11 : vector<1x64xf32> to vector<8x64xf32>
    %13 = arith.addf %10, %12 : vector<8x64xf32>
    %14 = math.tanh %13 : vector<8x64xf32>
    %c0_13 = arith.constant 0 : index
    %c0_14 = arith.constant 0 : index
    %15 = vector.load %arg7[%c0_13, %c0_14] : memref<64x512xf32, #tpu.memory_space<vmem>>, vector<64x512xf32>
    %cst_15 = arith.constant dense<0.000000e+00> : vector<8x512xf32>
    %16 = tpu.matmul %1, %15, %cst_15 {dimension_numbers = #tpu.dot_dimension_numbers<[1], [0], [0], [1], [0, 0, 1, 1], [], []>} : vector<8x64xf32>, vector<64x512xf32>, vector<8x512xf32> -> vector<8x512xf32>
    %c0_16 = arith.constant 0 : index
    %c0_17 = arith.constant 0 : index
    %17 = vector.load %arg8[%c0_16, %c0_17] : memref<1x512xf32, #tpu.memory_space<vmem>>, vector<1x512xf32>
    %18 = vector.broadcast %17 : vector<1x512xf32> to vector<8x512xf32>
    %19 = arith.addf %16, %18 : vector<8x512xf32>
    %cst_18 = arith.constant 0.000000e+00 : f32
    %20 = vector.broadcast %cst_18 : f32 to vector<8x512xf32>
    %21 = arith.maximumf %19, %20 : vector<8x512xf32>
    %c0_19 = arith.constant 0 : index
    %c0_20 = arith.constant 0 : index
    %22 = vector.load %arg9[%c0_19, %c0_20] : memref<512x64xf32, #tpu.memory_space<vmem>>, vector<512x64xf32>
    %cst_21 = arith.constant dense<0.000000e+00> : vector<8x64xf32>
    %23 = tpu.matmul %21, %22, %cst_21 {dimension_numbers = #tpu.dot_dimension_numbers<[1], [0], [0], [1], [0, 0, 1, 1], [], []>} : vector<8x512xf32>, vector<512x64xf32>, vector<8x64xf32> -> vector<8x64xf32>
    %c0_22 = arith.constant 0 : index
    %c0_23 = arith.constant 0 : index
    %24 = vector.load %arg10[%c0_22, %c0_23] : memref<1x64xf32, #tpu.memory_space<vmem>>, vector<1x64xf32>
    %25 = vector.broadcast %24 : vector<1x64xf32> to vector<8x64xf32>
    %26 = arith.addf %23, %25 : vector<8x64xf32>
    %27 = math.tanh %26 : vector<8x64xf32>
    %c0_24 = arith.constant 0 : index
    %c0_25 = arith.constant 0 : index
    %28 = vector.load %arg11[%c0_24, %c0_25] : memref<64x64xf32, #tpu.memory_space<vmem>>, vector<64x64xf32>
    %cst_26 = arith.constant dense<0.000000e+00> : vector<8x64xf32>
    %29 = tpu.matmul %0, %28, %cst_26 {dimension_numbers = #tpu.dot_dimension_numbers<[1], [0], [0], [1], [0, 0, 1, 1], [], []>} : vector<8x64xf32>, vector<64x64xf32>, vector<8x64xf32> -> vector<8x64xf32>
    %c0_27 = arith.constant 0 : index
    %c0_28 = arith.constant 0 : index
    %30 = vector.load %arg12[%c0_27, %c0_28] : memref<64x64xf32, #tpu.memory_space<vmem>>, vector<64x64xf32>
    %cst_29 = arith.constant dense<0.000000e+00> : vector<8x64xf32>
    %31 = tpu.matmul %1, %30, %cst_29 {dimension_numbers = #tpu.dot_dimension_numbers<[1], [0], [0], [1], [0, 0, 1, 1], [], []>} : vector<8x64xf32>, vector<64x64xf32>, vector<8x64xf32> -> vector<8x64xf32>
    %32 = arith.addf %29, %31 : vector<8x64xf32>
    %33 = arith.negf %32 : vector<8x64xf32>
    %34 = math.exp %33 : vector<8x64xf32>
    %cst_30 = arith.constant 1.000000e+00 : f32
    %35 = vector.broadcast %cst_30 : f32 to vector<8x64xf32>
    %36 = arith.addf %35, %34 : vector<8x64xf32>
    %37 = arith.divf %35, %36 : vector<8x64xf32>
    %38 = arith.mulf %37, %14 : vector<8x64xf32>
    %cst_31 = arith.constant 1.000000e+00 : f32
    %39 = vector.broadcast %cst_31 : f32 to vector<8x64xf32>
    %40 = arith.subf %39, %37 : vector<8x64xf32>
    %41 = arith.mulf %40, %27 : vector<8x64xf32>
    %42 = arith.addf %38, %41 : vector<8x64xf32>
    %cst_32 = arith.constant 5.000000e-01 : f32
    %43 = vector.broadcast %cst_32 : f32 to vector<8x64xf32>
    %44 = arith.cmpf ogt, %37, %43 : vector<8x64xf32>
    %cst_33 = arith.constant 1.000000e+00 : f32
    %cst_34 = arith.constant 0.000000e+00 : f32
    %45 = vector.broadcast %cst_33 : f32 to vector<8x64xf32>
    %46 = vector.broadcast %cst_34 : f32 to vector<8x64xf32>
    %47 = arith.select %44, %45, %46 : vector<8x64xi1>, vector<8x64xf32>
    %cst_35 = arith.constant dense<0.000000e+00> : vector<8xf32>
    %48 = vector.multi_reduction <add>, %47, %cst_35 [1] : vector<8x64xf32> to vector<8xf32>
    %49 = vector.shape_cast %48 : vector<8xf32> to vector<8x1xf32>
    %cst_36 = arith.constant 1.562500e+00 : f32
    %50 = vector.broadcast %cst_36 : f32 to vector<8x1xf32>
    %51 = arith.mulf %49, %50 : vector<8x1xf32>
    %cst_37 = arith.constant 6.400000e+01 : f32
    %52 = vector.broadcast %cst_37 : f32 to vector<8x1xf32>
    %53 = arith.subf %52, %49 : vector<8x1xf32>
    %cst_38 = arith.constant 1.562500e+00 : f32
    %54 = vector.broadcast %cst_38 : f32 to vector<8x1xf32>
    %55 = arith.mulf %53, %54 : vector<8x1xf32>
    %c0_39 = arith.constant 0 : index
    %c0_40 = arith.constant 0 : index
    %56 = vector.load %arg13[%c0_39, %c0_40] : memref<64x128xf32, #tpu.memory_space<vmem>>, vector<64x128xf32>
    %cst_41 = arith.constant dense<0.000000e+00> : vector<8x128xf32>
    %57 = tpu.matmul %42, %56, %cst_41 {dimension_numbers = #tpu.dot_dimension_numbers<[1], [0], [0], [1], [0, 0, 1, 1], [], []>} : vector<8x64xf32>, vector<64x128xf32>, vector<8x128xf32> -> vector<8x128xf32>
    %c0_42 = arith.constant 0 : index
    %c0_43 = arith.constant 0 : index
    %58 = vector.load %arg14[%c0_42, %c0_43] : memref<1x128xf32, #tpu.memory_space<vmem>>, vector<1x128xf32>
    %59 = vector.broadcast %58 : vector<1x128xf32> to vector<8x128xf32>
    %60 = arith.addf %57, %59 : vector<8x128xf32>
    %cst_44 = arith.constant 0.000000e+00 : f32
    %61 = vector.broadcast %cst_44 : f32 to vector<8x128xf32>
    %62 = arith.cmpf oge, %60, %61 : vector<8x128xf32>
    %cst_45 = arith.constant 0.00999999977 : f32
    %63 = vector.broadcast %cst_45 : f32 to vector<8x128xf32>
    %64 = arith.mulf %63, %60 : vector<8x128xf32>
    %65 = arith.select %62, %60, %64 : vector<8x128xi1>, vector<8x128xf32>
    %c0_46 = arith.constant 0 : index
    %c0_47 = arith.constant 0 : index
    %66 = vector.load %arg15[%c0_46, %c0_47] : memref<128x128xf32, #tpu.memory_space<vmem>>, vector<128x128xf32>
    %cst_48 = arith.constant dense<0.000000e+00> : vector<8x128xf32>
    %67 = tpu.matmul %65, %66, %cst_48 {dimension_numbers = #tpu.dot_dimension_numbers<[1], [0], [0], [1], [0, 0, 1, 1], [], []>} : vector<8x128xf32>, vector<128x128xf32>, vector<8x128xf32> -> vector<8x128xf32>
    %c0_49 = arith.constant 0 : index
    %c0_50 = arith.constant 0 : index
    %68 = vector.load %arg16[%c0_49, %c0_50] : memref<1x128xf32, #tpu.memory_space<vmem>>, vector<1x128xf32>
    %69 = vector.broadcast %68 : vector<1x128xf32> to vector<8x128xf32>
    %70 = arith.addf %67, %69 : vector<8x128xf32>
    %cst_51 = arith.constant 0.000000e+00 : f32
    %71 = vector.broadcast %cst_51 : f32 to vector<8x128xf32>
    %72 = arith.cmpf oge, %70, %71 : vector<8x128xf32>
    %cst_52 = arith.constant 0.00999999977 : f32
    %73 = vector.broadcast %cst_52 : f32 to vector<8x128xf32>
    %74 = arith.mulf %73, %70 : vector<8x128xf32>
    %75 = arith.select %72, %70, %74 : vector<8x128xi1>, vector<8x128xf32>
    %c0_53 = arith.constant 0 : index
    %c0_54 = arith.constant 0 : index
    %76 = vector.load %arg17[%c0_53, %c0_54] : memref<128x128xf32, #tpu.memory_space<vmem>>, vector<128x128xf32>
    %cst_55 = arith.constant dense<0.000000e+00> : vector<8x128xf32>
    %77 = tpu.matmul %75, %76, %cst_55 {dimension_numbers = #tpu.dot_dimension_numbers<[1], [0], [0], [1], [0, 0, 1, 1], [], []>} : vector<8x128xf32>, vector<128x128xf32>, vector<8x128xf32> -> vector<8x128xf32>
    %c0_56 = arith.constant 0 : index
    %c0_57 = arith.constant 0 : index
    %78 = vector.load %arg18[%c0_56, %c0_57] : memref<1x128xf32, #tpu.memory_space<vmem>>, vector<1x128xf32>
    %79 = vector.broadcast %78 : vector<1x128xf32> to vector<8x128xf32>
    %80 = arith.addf %77, %79 : vector<8x128xf32>
    %cst_58 = arith.constant dense<0xFF800000> : vector<8xf32>
    %81 = vector.multi_reduction <maximumf>, %80, %cst_58 [1] : vector<8x128xf32> to vector<8xf32>
    %82 = vector.shape_cast %81 : vector<8xf32> to vector<8x1xf32>
    %83 = vector.broadcast %82 : vector<8x1xf32> to vector<8x128xf32>
    %84 = arith.subf %80, %83 : vector<8x128xf32>
    %85 = math.exp %84 : vector<8x128xf32>
    %cst_59 = arith.constant dense<0.000000e+00> : vector<8xf32>
    %86 = vector.multi_reduction <add>, %85, %cst_59 [1] : vector<8x128xf32> to vector<8xf32>
    %87 = vector.shape_cast %86 : vector<8xf32> to vector<8x1xf32>
    %88 = tpu.reciprocal %87 : vector<8x1xf32> -> vector<8x1xf32>
    %89 = vector.broadcast %88 : vector<8x1xf32> to vector<8x128xf32>
    %90 = arith.mulf %85, %89 : vector<8x128xf32>
    %91 = tpu.iota {dimensions = array<i32: 1>} : vector<8x128xi32>
    %c126_i32 = arith.constant 126 : i32
    %92 = vector.broadcast %c126_i32 : i32 to vector<8x128xi32>
    %93 = arith.cmpi eq, %91, %92 : vector<8x128xi32>
    %c127_i32 = arith.constant 127 : i32
    %94 = vector.broadcast %c127_i32 : i32 to vector<8x128xi32>
    %95 = arith.cmpi eq, %91, %94 : vector<8x128xi32>
    %96 = vector.shape_cast %55 : vector<8x1xf32> to vector<8x1xf32>
    %97 = vector.broadcast %96 : vector<8x1xf32> to vector<8x128xf32>
    %98 = arith.select %95, %97, %90 : vector<8x128xi1>, vector<8x128xf32>
    %99 = vector.shape_cast %51 : vector<8x1xf32> to vector<8x1xf32>
    %100 = vector.broadcast %99 : vector<8x1xf32> to vector<8x128xf32>
    %101 = arith.select %93, %100, %98 : vector<8x128xi1>, vector<8x128xf32>
    %c0_60 = arith.constant 0 : index
    %c0_61 = arith.constant 0 : index
    %102 = vector.load %arg19[%c0_60, %c0_61] : memref<8x128xf32, #tpu.memory_space<vmem>>, vector<8x128xf32>
    tpu.vector_store %arg19[%c0_60, %c0_61], %101 {strides = array<i32>} : memref<8x128xf32, #tpu.memory_space<vmem>>, vector<8x128xf32>,
    return
  }
  func.func @transform_0(%arg0: i32) -> (i32, i32) {
    %c0_i32 = arith.constant 0 : i32
    %c0_i32_0 = arith.constant 0 : i32
    return %arg0, %c0_i32 : i32, i32
  }
  func.func @transform_1(%arg0: i32) -> (i32, i32) {
    %c0_i32 = arith.constant 0 : i32
    %c0_i32_0 = arith.constant 0 : i32
    return %arg0, %c0_i32 : i32, i32
  }
  func.func @transform_2(%arg0: i32) -> (i32, i32) {
    %c0_i32 = arith.constant 0 : i32
    %c0_i32_0 = arith.constant 0 : i32
    %c0_i32_1 = arith.constant 0 : i32
    return %c0_i32, %c0_i32_0 : i32, i32
  }
  func.func @transform_3(%arg0: i32) -> (i32, i32) {
    %c0_i32 = arith.constant 0 : i32
    %c0_i32_0 = arith.constant 0 : i32
    %c0_i32_1 = arith.constant 0 : i32
    return %c0_i32, %c0_i32_0 : i32, i32
  }
  func.func @transform_4(%arg0: i32) -> (i32, i32) {
    %c0_i32 = arith.constant 0 : i32
    %c0_i32_0 = arith.constant 0 : i32
    %c0_i32_1 = arith.constant 0 : i32
    return %c0_i32, %c0_i32_0 : i32, i32
  }
  func.func @transform_5(%arg0: i32) -> (i32, i32) {
    %c0_i32 = arith.constant 0 : i32
    %c0_i32_0 = arith.constant 0 : i32
    %c0_i32_1 = arith.constant 0 : i32
    return %c0_i32, %c0_i32_0 : i32, i32
  }
  func.func @transform_6(%arg0: i32) -> (i32, i32) {
    %c0_i32 = arith.constant 0 : i32
    %c0_i32_0 = arith.constant 0 : i32
    %c0_i32_1 = arith.constant 0 : i32
    return %c0_i32, %c0_i32_0 : i32, i32
  }
  func.func @transform_7(%arg0: i32) -> (i32, i32) {
    %c0_i32 = arith.constant 0 : i32
    %c0_i32_0 = arith.constant 0 : i32
    %c0_i32_1 = arith.constant 0 : i32
    return %c0_i32, %c0_i32_0 : i32, i32
  }
  func.func @transform_8(%arg0: i32) -> (i32, i32) {
    %c0_i32 = arith.constant 0 : i32
    %c0_i32_0 = arith.constant 0 : i32
    %c0_i32_1 = arith.constant 0 : i32
    return %c0_i32, %c0_i32_0 : i32, i32
  }
  func.func @transform_9(%arg0: i32) -> (i32, i32) {
    %c0_i32 = arith.constant 0 : i32
    %c0_i32_0 = arith.constant 0 : i32
    %c0_i32_1 = arith.constant 0 : i32
    return %c0_i32, %c0_i32_0 : i32, i32
  }
  func.func @transform_10(%arg0: i32) -> (i32, i32) {
    %c0_i32 = arith.constant 0 : i32
    %c0_i32_0 = arith.constant 0 : i32
    %c0_i32_1 = arith.constant 0 : i32
    return %c0_i32, %c0_i32_0 : i32, i32
  }
  func.func @transform_11(%arg0: i32) -> (i32, i32) {
    %c0_i32 = arith.constant 0 : i32
    %c0_i32_0 = arith.constant 0 : i32
    %c0_i32_1 = arith.constant 0 : i32
    return %c0_i32, %c0_i32_0 : i32, i32
  }
  func.func @transform_12(%arg0: i32) -> (i32, i32) {
    %c0_i32 = arith.constant 0 : i32
    %c0_i32_0 = arith.constant 0 : i32
    %c0_i32_1 = arith.constant 0 : i32
    return %c0_i32, %c0_i32_0 : i32, i32
  }
  func.func @transform_13(%arg0: i32) -> (i32, i32) {
    %c0_i32 = arith.constant 0 : i32
    %c0_i32_0 = arith.constant 0 : i32
    %c0_i32_1 = arith.constant 0 : i32
    return %c0_i32, %c0_i32_0 : i32, i32
  }
  func.func @transform_14(%arg0: i32) -> (i32, i32) {
    %c0_i32 = arith.constant 0 : i32
    %c0_i32_0 = arith.constant 0 : i32
    %c0_i32_1 = arith.constant 0 : i32
    return %c0_i32, %c0_i32_0 : i32, i32
  }
  func.func @transform_15(%arg0: i32) -> (i32, i32) {
    %c0_i32 = arith.constant 0 : i32
    %c0_i32_0 = arith.constant 0 : i32
    %c0_i32_1 = arith.constant 0 : i32
    return %c0_i32, %c0_i32_0 : i32, i32
  }
  func.func @transform_16(%arg0: i32) -> (i32, i32) {
    %c0_i32 = arith.constant 0 : i32
    %c0_i32_0 = arith.constant 0 : i32
    %c0_i32_1 = arith.constant 0 : i32
    return %c0_i32, %c0_i32_0 : i32, i32
  }
  func.func @transform_17(%arg0: i32) -> (i32, i32) {
    %c0_i32 = arith.constant 0 : i32
    %c0_i32_0 = arith.constant 0 : i32
    %c0_i32_1 = arith.constant 0 : i32
    return %c0_i32, %c0_i32_0 : i32, i32
  }
  func.func @transform_18(%arg0: i32) -> (i32, i32) {
    %c0_i32 = arith.constant 0 : i32
    %c0_i32_0 = arith.constant 0 : i32
    return %arg0, %c0_i32 : i32, i32
  }
}

</mosaic_0001>

<bundles_post_ra>
// kernel: integrated_forward.1
= control target key start
LH: loop header
LB: loop body
LE: loop exit
PB: predicated region body
PF: predicated region fallthrough
CT: control target
= control target key end

     0   :  { %v1721_v3 = vmov 0.0   ;;  %vm115_vm0 = vcmask 523264   ;;  %vm1722_vm1 = vmmov 0   ;;  %s2708_s2 = inlined_call_operand.vmem [shape: f32[64,512], index: 2, kind: input, shape index: {}]   ;;  %s2709_s0 = inlined_call_operand.vmem [shape: f32[8,64], index: 0, kind: input, shape index: {}]   ;;  %s2710_s4 = inlined_call_operand.vmem [shape: f32[512,64], index: 4, kind: input, shape index: {}]   ;;  %s2711_s6 = inlined_call_operand.vmem [shape: f32[64,512], index: 6, kind: input, shape index: {}]   ;;  %s2712_s3 = inlined_call_operand.vmem [shape: f32[1,512], index: 3, kind: input, shape index: {}]   ;;  %s2713_s1 = inlined_call_operand.vmem [shape: f32[8,64], index: 1, kind: input, shape index: {}]   ;;  %s2714_s8 = inlined_call_operand.vmem [shape: f32[512,64], index: 8, kind: input, shape index: {}]   ;;  %s2715_s5 = inlined_call_operand.vmem [shape: f32[1,64], index: 5, kind: input, shape index: {}]   ;;  %s2716_s7 = inlined_call_operand.vmem [shape: f32[1,512], index: 7, kind: input, shape index: {}]   ;;  %s2717_s11 = inlined_call_operand.vmem [shape: f32[64,64], index: 11, kind: input, shape index: {}]   ;;  %s2718_s10 = inlined_call_operand.vmem [shape: f32[64,64], index: 10, kind: input, shape index: {}]   ;;  %s2719_s12 = inlined_call_operand.vmem [shape: f32[64,128], index: 12, kind: input, shape index: {}]   ;;  %s2720_s9 = inlined_call_operand.vmem [shape: f32[1,64], index: 9, kind: input, shape index: {}]   ;;  %s2721_s14 = inlined_call_operand.vmem [shape: f32[128,128], index: 14, kind: input, shape index: {}]   ;;  %s2722_s16 = inlined_call_operand.vmem [shape: f32[128,128], index: 16, kind: input, shape index: {}]   ;;  %s2723_s13 = inlined_call_operand.vmem [shape: f32[1,128], index: 13, kind: input, shape index: {}]   ;;  %s2724_s15 = inlined_call_operand.vmem [shape: f32[1,128], index: 15, kind: input, shape index: {}]   ;;  %s2725_s17 = inlined_call_operand.vmem [shape: f32[1,128], index: 17, kind: input, shape index: {}]   ;;  %s2726_s18 = inlined_call_operand.vmem [shape: f32[8,128], index: 18, kind: output, shape index: {}]  }
   0x1   :  { %2729 = sst [smem:[#allocation2_spill]] %s2708_s2  ;;  %183 = vmatprep.mubr.f32.mxu0 %v1721_v3  ;;  %254 = vmatprep.mubr.f32.mxu1 %v1721_v3 }
   0x2   :  { %2730 = sst [smem:[#allocation3_spill]] %s2709_s0 }
   0x3   :  { %2731 = sst [smem:[#allocation4_spill]] %s2710_s4 }
   0x4   :  { %s2732_s29 = sld [smem:[#allocation2_spill]] }
   0x5   :  { %s2733_s23 = sld [smem:[#allocation3_spill]] }
   0x6   :  { %s2734_s26 = sld [smem:[#allocation4_spill]] }
   0xa   :  { %v90_v0 = vld [vmem:[%s2732_s29 + $0xe8] sm:$0xff]  ;;  %v92_v1 = vld [vmem:[%s2732_s29 + $0xf8] sm:$0xff]  ;;  %v89_v2 = vld [vmem:[%s2732_s29 + $0xe0] sm:$0xff] }
   0xb   :  { %135 = vmatprep.subr.mxu0 %v90_v0  ;;  %206 = vmatprep.subr.mxu1 %v92_v1  ;;  %v91_v4 = vld [vmem:[%s2732_s29 + $0xf0] sm:$0xff]  ;;  %v86_v5 = vld [vmem:[%s2732_s29 + $0xc8] sm:$0xff]  ;;  %v88_v6 = vld [vmem:[%s2732_s29 + $0xd8] sm:$0xff] }
   0xc   :  { %136 = vmatpush1.msra.mxu0 %v89_v2  ;;  %207 = vmatpush1.msra.mxu1 %v91_v4  ;;  %v85_v7 = vld [vmem:[%s2732_s29 + $0xc0] sm:$0xff]  ;;  %v87_v8 = vld [vmem:[%s2732_s29 + $0xd0] sm:$0xff]  ;;  %v82_v9 = vld [vmem:[%s2732_s29 + $0xa8] sm:$0xff] }
   0xd   :  { %137 = vmatprep.subr.mxu0 %v86_v5  ;;  %208 = vmatprep.subr.mxu1 %v88_v6  ;;  %v84_v10 = vld [vmem:[%s2732_s29 + $0xb8] sm:$0xff]  ;;  %v81_v11 = vld [vmem:[%s2732_s29 + $0xa0] sm:$0xff]  ;;  %v83_v12 = vld [vmem:[%s2732_s29 + $0xb0] sm:$0xff] }
   0xe   :  { %138 = vmatpush1.msra.mxu0 %v85_v7  ;;  %209 = vmatpush1.msra.mxu1 %v87_v8  ;;  %v78_v13 = vld [vmem:[%s2732_s29 + $0x88] sm:$0xff]  ;;  %v80_v14 = vld [vmem:[%s2732_s29 + $0x98] sm:$0xff]  ;;  %v77_v15 = vld [vmem:[%s2732_s29 + $0x80] sm:$0xff] }
   0xf   :  { %139 = vmatprep.subr.mxu0 %v82_v9  ;;  %210 = vmatprep.subr.mxu1 %v84_v10  ;;  %v79_v16 = vld [vmem:[%s2732_s29 + $0x90] sm:$0xff]  ;;  %v74_v17 = vld [vmem:[%s2732_s29 + $0x68] sm:$0xff]  ;;  %v76_v18 = vld [vmem:[%s2732_s29 + $0x78] sm:$0xff] }
  0x10   :  { %140 = vmatpush1.msra.mxu0 %v81_v11  ;;  %211 = vmatpush1.msra.mxu1 %v83_v12  ;;  %v73_v19 = vld [vmem:[%s2732_s29 + $0x60] sm:$0xff]  ;;  %v75_v20 = vld [vmem:[%s2732_s29 + $0x70] sm:$0xff]  ;;  %v70_v21 = vld [vmem:[%s2732_s29 + $0x48] sm:$0xff] }
  0x11   :  { %141 = vmatprep.subr.mxu0 %v78_v13  ;;  %212 = vmatprep.subr.mxu1 %v80_v14  ;;  %v72_v22 = vld [vmem:[%s2732_s29 + $0x58] sm:$0xff]  ;;  %v69_v23 = vld [vmem:[%s2732_s29 + $0x40] sm:$0xff]  ;;  %v71_v24 = vld [vmem:[%s2732_s29 + $0x50] sm:$0xff] }
  0x12   :  { %142 = vmatpush1.msra.mxu0 %v77_v15  ;;  %213 = vmatpush1.msra.mxu1 %v79_v16  ;;  %v66_v25 = vld [vmem:[%s2732_s29 + $0x28] sm:$0xff]  ;;  %v68_v26 = vld [vmem:[%s2732_s29 + $0x38] sm:$0xff]  ;;  %v65_v27 = vld [vmem:[%s2732_s29 + $0x20] sm:$0xff] }
  0x13   :  { %143 = vmatprep.subr.mxu0 %v74_v17  ;;  %214 = vmatprep.subr.mxu1 %v76_v18  ;;  %v67_v28 = vld [vmem:[%s2732_s29 + $0x30] sm:$0xff]  ;;  %v62_v29 = vld [vmem:[%s2732_s29 + $0x8] sm:$0xff]  ;;  %v64_v30 = vld [vmem:[%s2732_s29 + $0x18] sm:$0xff] }
  0x14   :  { %144 = vmatpush1.msra.mxu0 %v73_v19  ;;  %215 = vmatpush1.msra.mxu1 %v75_v20  ;;  %v61_v31 = vld [vmem:[%s2732_s29] sm:$0xff]  ;;  %v63_v32 = vld [vmem:[%s2732_s29 + $0x10] sm:$0xff]  ;;  %v296_v34 = vld [vmem:[%s2734_s26 + $0xf8] sm:$0xff] }
  0x15   :  { %145 = vmatprep.subr.mxu0 %v70_v21  ;;  %216 = vmatprep.subr.mxu1 %v72_v22  ;;  %v1919_v33 = vld [vmem:[%s2733_s23] sm:$0xff]  ;;  %v328_v35 = vld [vmem:[%s2734_s26 + $0x1f8] sm:$0xff]  ;;  %v295_v38 = vld [vmem:[%s2734_s26 + $0xf0] sm:$0xff] }
  0x16   :  { %146 = vmatpush1.msra.mxu0 %v69_v23  ;;  %217 = vmatpush1.msra.mxu1 %v71_v24  ;;  %v280_v36 = vld [vmem:[%s2734_s26 + $0x78] sm:$0xff]  ;;  %v327_v39 = vld [vmem:[%s2734_s26 + $0x1f0] sm:$0xff]  ;;  %v294_v42 = vld [vmem:[%s2734_s26 + $0xe8] sm:$0xff] }
  0x17   :  { %147 = vmatprep.subr.mxu0 %v66_v25  ;;  %218 = vmatprep.subr.mxu1 %v68_v26  ;;  %v312_v37 = vld [vmem:[%s2734_s26 + $0x178] sm:$0xff]  ;;  %v279_v40 = vld [vmem:[%s2734_s26 + $0x70] sm:$0xff]  ;;  %v326_v43 = vld [vmem:[%s2734_s26 + $0x1e8] sm:$0xff] }
  0x18   :  { %148 = vmatpush1.msra.mxu0 %v65_v27  ;;  %219 = vmatpush1.msra.mxu1 %v67_v28  ;;  %v311_v41 = vld [vmem:[%s2734_s26 + $0x170] sm:$0xff]  ;;  %v278_v44 = vld [vmem:[%s2734_s26 + $0x68] sm:$0xff]  ;;  %v293_v46 = vld [vmem:[%s2734_s26 + $0xe0] sm:$0xff] }
  0x19   :  { %149 = vmatprep.subr.mxu0 %v62_v29  ;;  %220 = vmatprep.subr.mxu1 %v64_v30  ;;  %v310_v45 = vld [vmem:[%s2734_s26 + $0x168] sm:$0xff]  ;;  %v325_v47 = vld [vmem:[%s2734_s26 + $0x1e0] sm:$0xff]  ;;  %v292_v50 = vld [vmem:[%s2734_s26 + $0xd8] sm:$0xff] }
  0x1a   :  { %150 = vmatpush1.msra.mxu0 %v61_v31  ;;  %221 = vmatpush1.msra.mxu1 %v63_v32  ;;  %v277_v48 = vld [vmem:[%s2734_s26 + $0x60] sm:$0xff]  ;;  %v324_v51 = vld [vmem:[%s2734_s26 + $0x1d8] sm:$0xff]  ;;  %v291_v54 = vld [vmem:[%s2734_s26 + $0xd0] sm:$0xff] }
  0x1b   :  { %1366 = vmatmul.mubr.msk.f32.vlgmr.msra.gmra.mxu0 %vm115_vm0, %v1919_v33  ;;  %1367 = vmatmul.mubr.msk.f32.vlgmr.msra.gmra.mxu1 %vm115_vm0, %v1919_v33  ;;  %v309_v49 = vld [vmem:[%s2734_s26 + $0x160] sm:$0xff]  ;;  %v276_v52 = vld [vmem:[%s2734_s26 + $0x58] sm:$0xff]  ;;  %v323_v55 = vld [vmem:[%s2734_s26 + $0x1d0] sm:$0xff] }
  0x1c   :  { %1379 = vmatprep.subr.mxu0 %v296_v34  ;;  %1414 = vmatprep.subr.mxu1 %v328_v35  ;;  %v308_v53 = vld [vmem:[%s2734_s26 + $0x158] sm:$0xff]  ;;  %v275_v56 = vld [vmem:[%s2734_s26 + $0x50] sm:$0xff]  ;;  %v290_v58 = vld [vmem:[%s2734_s26 + $0xc8] sm:$0xff] }
  0x1d   :  { %1380 = vmatpush3.msra.mxu0 %v280_v36  ;;  %1415 = vmatpush3.msra.mxu1 %v312_v37  ;;  %v307_v57 = vld [vmem:[%s2734_s26 + $0x150] sm:$0xff]  ;;  %v322_v59 = vld [vmem:[%s2734_s26 + $0x1c8] sm:$0xff]  ;;  %v289_v62 = vld [vmem:[%s2734_s26 + $0xc0] sm:$0xff] }
  0x1e   :  { %1381 = vmatprep.subr.mxu0 %v295_v38  ;;  %1416 = vmatprep.subr.mxu1 %v327_v39  ;;  %v274_v60 = vld [vmem:[%s2734_s26 + $0x48] sm:$0xff]  ;;  %v321_v63 = vld [vmem:[%s2734_s26 + $0x1c0] sm:$0xff]  ;;  %v288_v2 = vld [vmem:[%s2734_s26 + $0xb8] sm:$0xff]  ;;  %v95_v38 = vlaneseq }
  0x1f   :  { %1382 = vmatpush3.msra.mxu0 %v279_v40  ;;  %1417 = vmatpush3.msra.mxu1 %v311_v41  ;;  %v306_v61 = vld [vmem:[%s2734_s26 + $0x148] sm:$0xff]  ;;  %v273_v0 = vld [vmem:[%s2734_s26 + $0x40] sm:$0xff]  ;;  %v320_v4 = vld [vmem:[%s2734_s26 + $0x1b8] sm:$0xff] }
  0x20   :  { %1383 = vmatprep.subr.mxu0 %v294_v42  ;;  %1418 = vmatprep.subr.mxu1 %v326_v43  ;;  %v305_v1 = vld [vmem:[%s2734_s26 + $0x140] sm:$0xff]  ;;  %v272_v5 = vld [vmem:[%s2734_s26 + $0x38] sm:$0xff]  ;;  %v287_v7 = vld [vmem:[%s2734_s26 + $0xb0] sm:$0xff]  ;;  %v2124_v39 = vshrl.u32 %v95_v38, 7 }
  0x21   :  { %1384 = vmatpush3.msra.mxu0 %v278_v44  ;;  %1419 = vmatpush3.msra.mxu1 %v310_v45  ;;  %v304_v6 = vld [vmem:[%s2734_s26 + $0x138] sm:$0xff]  ;;  %v319_v8 = vld [vmem:[%s2734_s26 + $0x1b0] sm:$0xff]  ;;  %v286_v11 = vld [vmem:[%s2734_s26 + $0xa8] sm:$0xff] }
  0x22   :  { %1385 = vmatprep.subr.mxu0 %v293_v46  ;;  %1420 = vmatprep.subr.mxu1 %v325_v47  ;;  %v271_v9 = vld [vmem:[%s2734_s26 + $0x30] sm:$0xff]  ;;  %v318_v12 = vld [vmem:[%s2734_s26 + $0x1a8] sm:$0xff]  ;;  %v285_v15 = vld [vmem:[%s2734_s26 + $0xa0] sm:$0xff]  ;;  %v97_v40 = vsub.s32 0, %v2124_v39  ;;  %v105_v41 = vsub.s32 2, %v2124_v39  ;;  %v101_v43 = vsub.s32 1, %v2124_v39 }
  0x23   :  { %1386 = vmatpush3.msra.mxu0 %v277_v48  ;;  %1421 = vmatpush3.msra.mxu1 %v309_v49  ;;  %v303_v10 = vld [vmem:[%s2734_s26 + $0x130] sm:$0xff]  ;;  %v270_v13 = vld [vmem:[%s2734_s26 + $0x28] sm:$0xff]  ;;  %v317_v16 = vld [vmem:[%s2734_s26 + $0x1a0] sm:$0xff]  ;;  %v109_v44 = vsub.s32 3, %v2124_v39 }
  0x24   :  { %1387 = vmatprep.subr.mxu0 %v292_v50  ;;  %1422 = vmatprep.subr.mxu1 %v324_v51  ;;  %v302_v14 = vld [vmem:[%s2734_s26 + $0x128] sm:$0xff]  ;;  %v269_v17 = vld [vmem:[%s2734_s26 + $0x20] sm:$0xff]  ;;  %v284_v19 = vld [vmem:[%s2734_s26 + $0x98] sm:$0xff] }
  0x25   :  { %1388 = vmatpush3.msra.mxu0 %v276_v52  ;;  %1423 = vmatpush3.msra.mxu1 %v308_v53  ;;  %v301_v18 = vld [vmem:[%s2734_s26 + $0x120] sm:$0xff]  ;;  %v316_v20 = vld [vmem:[%s2734_s26 + $0x198] sm:$0xff]  ;;  %v283_v23 = vld [vmem:[%s2734_s26 + $0x90] sm:$0xff] }
  0x26   :  { %1389 = vmatprep.subr.mxu0 %v291_v54  ;;  %1424 = vmatprep.subr.mxu1 %v323_v55  ;;  %v268_v21 = vld [vmem:[%s2734_s26 + $0x18] sm:$0xff]  ;;  %v315_v24 = vld [vmem:[%s2734_s26 + $0x190] sm:$0xff]  ;;  %v282_v27 = vld [vmem:[%s2734_s26 + $0x88] sm:$0xff] }
  0x27   :  { %1390 = vmatpush3.msra.mxu0 %v275_v56  ;;  %1425 = vmatpush3.msra.mxu1 %v307_v57  ;;  %v300_v22 = vld [vmem:[%s2734_s26 + $0x118] sm:$0xff]  ;;  %v267_v25 = vld [vmem:[%s2734_s26 + $0x10] sm:$0xff]  ;;  %v314_v28 = vld [vmem:[%s2734_s26 + $0x188] sm:$0xff] }
  0x28   :  { %1391 = vmatprep.subr.mxu0 %v290_v58  ;;  %1426 = vmatprep.subr.mxu1 %v322_v59  ;;  %v299_v26 = vld [vmem:[%s2734_s26 + $0x110] sm:$0xff]  ;;  %v266_v29 = vld [vmem:[%s2734_s26 + $0x8] sm:$0xff]  ;;  %v281_v31 = vld [vmem:[%s2734_s26 + $0x80] sm:$0xff] }
  0x29   :  { %1392 = vmatpush3.msra.mxu0 %v274_v60  ;;  %1427 = vmatpush3.msra.mxu1 %v306_v61  ;;  %v298_v30 = vld [vmem:[%s2734_s26 + $0x108] sm:$0xff]  ;;  %v313_v32 = vld [vmem:[%s2734_s26 + $0x180] sm:$0xff]  ;;  %v508_v37 = vld [vmem:[%s2711_s6 + $0xf8] sm:$0xff] }
  0x2a   :  { %1393 = vmatprep.subr.mxu0 %v289_v62  ;;  %1428 = vmatprep.subr.mxu1 %v321_v63  ;;  %v265_v34 = vld [vmem:[%s2734_s26] sm:$0xff]  ;;  %v506_v36 = vld [vmem:[%s2711_s6 + $0xe8] sm:$0xff]  ;;  %v507_v62 = vld [vmem:[%s2711_s6 + $0xf0] sm:$0xff] }
  0x2b   :  { %1394 = vmatpush3.msra.mxu0 %v273_v0  ;;  %1429 = vmatpush3.msra.mxu1 %v305_v1  ;;  %v297_v35 = vld [vmem:[%s2734_s26 + $0x100] sm:$0xff]  ;;  %v502_v63 = vld [vmem:[%s2711_s6 + $0xc8] sm:$0xff]  ;;  %v504_v0 = vld [vmem:[%s2711_s6 + $0xd8] sm:$0xff] }
  0x2c   :  { %1395 = vmatprep.subr.mxu0 %v288_v2  ;;  %1430 = vmatprep.subr.mxu1 %v320_v4  ;;  %v93_v42 = vld [vmem:[%s2712_s3] sm:$0xf]  ;;  %v503_v2 = vld [vmem:[%s2711_s6 + $0xd0] sm:$0xff]  ;;  %v498_v4 = vld [vmem:[%s2711_s6 + $0xa8] sm:$0xff] }
  0x2d   :  { %1396 = vmatpush3.msra.mxu0 %v272_v5  ;;  %1431 = vmatpush3.msra.mxu1 %v304_v6  ;;  %v98_v45 = vrot.slane %v93_v42, %v97_v40  ;;  %v106_v46 = vrot.slane %v93_v42, %v105_v41  ;;  %v102_v47 = vrot.slane %v93_v42, %v101_v43  ;;  %v505_v61 = vld [vmem:[%s2711_s6 + $0xe0] sm:$0xff]  ;;  %v500_v5 = vld [vmem:[%s2711_s6 + $0xb8] sm:$0xff] }
  0x2e   :  { %1397 = vmatprep.subr.mxu0 %v287_v7  ;;  %1432 = vmatprep.subr.mxu1 %v319_v8  ;;  %v110_v48 = vrot.slane %v93_v42, %v109_v44  ;;  %v501_v1 = vld [vmem:[%s2711_s6 + $0xc0] sm:$0xff]  ;;  %v499_v7 = vld [vmem:[%s2711_s6 + $0xb0] sm:$0xff]  ;;  %v494_v8 = vld [vmem:[%s2711_s6 + $0x88] sm:$0xff] }
  0x2f   :  { %1398 = vmatpush3.msra.mxu0 %v271_v9  ;;  %1433 = vmatpush3.msra.mxu1 %v303_v10  ;;  %v497_v6 = vld [vmem:[%s2711_s6 + $0xa0] sm:$0xff]  ;;  %v496_v9 = vld [vmem:[%s2711_s6 + $0x98] sm:$0xff]  ;;  %v709_v42 = vld [vmem:[%s2714_s8 + $0xe8] sm:$0xff] }
  0x30   :  { %1399 = vmatprep.subr.mxu0 %v286_v11  ;;  %1434 = vmatprep.subr.mxu1 %v318_v12  ;;  %v493_v10 = vld [vmem:[%s2711_s6 + $0x80] sm:$0xff]  ;;  %v495_v11 = vld [vmem:[%s2711_s6 + $0x90] sm:$0xff]  ;;  %v490_v12 = vld [vmem:[%s2711_s6 + $0x68] sm:$0xff] }
  0x31   :  { %1400 = vmatpush3.msra.mxu0 %v270_v13  ;;  %1435 = vmatpush3.msra.mxu1 %v302_v14  ;;  %v492_v13 = vld [vmem:[%s2711_s6 + $0x78] sm:$0xff]  ;;  %v489_v14 = vld [vmem:[%s2711_s6 + $0x60] sm:$0xff] }
  0x32   :  { %1401 = vmatprep.subr.mxu0 %v285_v15  ;;  %1436 = vmatprep.subr.mxu1 %v317_v16  ;;  %v491_v15 = vld [vmem:[%s2711_s6 + $0x70] sm:$0xff]  ;;  %v486_v16 = vld [vmem:[%s2711_s6 + $0x48] sm:$0xff]  ;;  %v899_v39 = vld [vmem:[%s2718_s10 + $0x38] sm:$0xff] }
  0x33   :  { %1402 = vmatpush3.msra.mxu0 %v269_v17  ;;  %1437 = vmatpush3.msra.mxu1 %v301_v18  ;;  %v488_v17 = vld [vmem:[%s2711_s6 + $0x58] sm:$0xff]  ;;  %v485_v18 = vld [vmem:[%s2711_s6 + $0x40] sm:$0xff] }
  0x34   :  { %1403 = vmatprep.subr.mxu0 %v284_v19  ;;  %1438 = vmatprep.subr.mxu1 %v316_v20  ;;  %v487_v19 = vld [vmem:[%s2711_s6 + $0x50] sm:$0xff]  ;;  %v482_v20 = vld [vmem:[%s2711_s6 + $0x28] sm:$0xff] }
  0x35   :  { %1404 = vmatpush3.msra.mxu0 %v268_v21  ;;  %1439 = vmatpush3.msra.mxu1 %v300_v22  ;;  %v484_v21 = vld [vmem:[%s2711_s6 + $0x38] sm:$0xff]  ;;  %v481_v22 = vld [vmem:[%s2711_s6 + $0x20] sm:$0xff] }
  0x36   :  { %1405 = vmatprep.subr.mxu0 %v283_v23  ;;  %1440 = vmatprep.subr.mxu1 %v315_v24  ;;  %v483_v23 = vld [vmem:[%s2711_s6 + $0x30] sm:$0xff]  ;;  %v478_v24 = vld [vmem:[%s2711_s6 + $0x8] sm:$0xff] }
  0x37   :  { %1406 = vmatpush3.msra.mxu0 %v267_v25  ;;  %1441 = vmatpush3.msra.mxu1 %v299_v26  ;;  %v480_v25 = vld [vmem:[%s2711_s6 + $0x18] sm:$0xff]  ;;  %v477_v26 = vld [vmem:[%s2711_s6] sm:$0xff] }
  0x38   :  { %1407 = vmatprep.subr.mxu0 %v282_v27  ;;  %1442 = vmatprep.subr.mxu1 %v314_v28  ;;  %v479_v27 = vld [vmem:[%s2711_s6 + $0x10] sm:$0xff]  ;;  %v2234_v28 = vld [vmem:[%s2713_s1] sm:$0xff] }
  0x39   :  { %1408 = vmatpush3.msra.mxu0 %v266_v29  ;;  %1443 = vmatpush3.msra.mxu1 %v298_v30  ;;  %v711_v29 = vld [vmem:[%s2714_s8 + $0xf8] sm:$0xff] }
  0x3a   :  { %1409 = vmatprep.subr.mxu0 %v281_v31  ;;  %1444 = vmatprep.subr.mxu1 %v313_v32  ;;  %v743_v30 = vld [vmem:[%s2714_s8 + $0x1f8] sm:$0xff] }
  0x3b   :  { %1410 = vmatpush3.msra.mxu0 %v265_v34  ;;  %1445 = vmatpush3.msra.mxu1 %v297_v35  ;;  %v695_v31 = vld [vmem:[%s2714_s8 + $0x78] sm:$0xff]  ;;  %v710_v34 = vld [vmem:[%s2714_s8 + $0xf0] sm:$0xff] }
  0x3c   :  { %550 = vmatprep.subr.mxu0 %v506_v36  ;;  %621 = vmatprep.subr.mxu1 %v508_v37  ;;  %v727_v32 = vld [vmem:[%s2714_s8 + $0x178] sm:$0xff]  ;;  %v742_v35 = vld [vmem:[%s2714_s8 + $0x1f0] sm:$0xff] }
  0x3d   :  { %v694_v36 = vld [vmem:[%s2714_s8 + $0x70] sm:$0xff] }
  0x3e   :  { %v726_v37 = vld [vmem:[%s2714_s8 + $0x170] sm:$0xff] }
  0xdb   :  { %v185_v49 = vpop.f32.mrf.mxu0  ;;  %v256_v50 = vpop.f32.mrf.mxu1 }
  0xdc   :  { %v186_v51 = vadd.f32 %v185_v49, %v98_v45  ;;  %v257_v52 = vadd.f32 %v256_v50, %v106_v46  ;;  %v741_v45 = vld [vmem:[%s2714_s8 + $0x1e8] sm:$0xff]  ;;  %v740_v49 = vld [vmem:[%s2714_s8 + $0x1e0] sm:$0xff] }
  0xdd   :  { %v187_v53 = vpop.f32.mrf.mxu0  ;;  %v258_v54 = vpop.f32.mrf.mxu1  ;;  %v693_v46 = vld [vmem:[%s2714_s8 + $0x68] sm:$0xff]  ;;  %v692_v50 = vld [vmem:[%s2714_s8 + $0x60] sm:$0xff] }
  0xde   :  { %v188_v55 = vadd.f32 %v187_v53, %v102_v47  ;;  %v259_v56 = vadd.f32 %v258_v54, %v110_v48  ;;  %v261_v59 = vmax.f32 %v186_v51, 0.0  ;;  %v263_v60 = vmax.f32 %v257_v52, 0.0  ;;  %v725_v47 = vld [vmem:[%s2714_s8 + $0x168] sm:$0xff]  ;;  %v708_v48 = vld [vmem:[%s2714_s8 + $0xe0] sm:$0xff]  ;;  %v707_v52 = vld [vmem:[%s2714_s8 + $0xd8] sm:$0xff] }
  0xdf   :  { %v724_v51 = vld [vmem:[%s2714_s8 + $0x160] sm:$0xff]  ;;  %v739_v53 = vld [vmem:[%s2714_s8 + $0x1d8] sm:$0xff] }
  0xe0   :  { %v262_v57 = vmax.f32 %v188_v55, 0.0  ;;  %v264_v58 = vmax.f32 %v259_v56, 0.0  ;;  %v691_v54 = vld [vmem:[%s2714_s8 + $0x58] sm:$0xff]  ;;  %v706_v56 = vld [vmem:[%s2714_s8 + $0xd0] sm:$0xff] }
  0xe1   :  { %v723_v55 = vld [vmem:[%s2714_s8 + $0x158] sm:$0xff] }
  0xe2   :  { %400 = vmatprep.mubr.f32.mxu0 %v262_v57  ;;  %470 = vmatprep.mubr.f32.mxu1 %v264_v58  ;;  %v738_v57 = vld [vmem:[%s2714_s8 + $0x1d0] sm:$0xff] }
  0xe3   :  { %401 = vmatmul.mubr.f32.vlgmr.msra.gmra.mxu0 %v261_v59  ;;  %471 = vmatmul.mubr.f32.vlgmr.msra.gmra.mxu1 %v263_v60  ;;  %v690_v58 = vld [vmem:[%s2714_s8 + $0x50] sm:$0xff]  ;;  %v705_v60 = vld [vmem:[%s2714_s8 + $0xc8] sm:$0xff] }
  0xe4   :  { %551 = vmatpush1.msra.mxu0 %v505_v61  ;;  %622 = vmatpush1.msra.mxu1 %v507_v62  ;;  %v722_v59 = vld [vmem:[%s2714_s8 + $0x150] sm:$0xff]  ;;  %v737_v61 = vld [vmem:[%s2714_s8 + $0x1c8] sm:$0xff] }
  0xe5   :  { %552 = vmatprep.subr.mxu0 %v502_v63  ;;  %623 = vmatprep.subr.mxu1 %v504_v0  ;;  %v689_v62 = vld [vmem:[%s2714_s8 + $0x48] sm:$0xff]  ;;  %v704_v0 = vld [vmem:[%s2714_s8 + $0xc0] sm:$0xff] }
  0xe6   :  { %553 = vmatpush1.msra.mxu0 %v501_v1  ;;  %624 = vmatpush1.msra.mxu1 %v503_v2  ;;  %v721_v63 = vld [vmem:[%s2714_s8 + $0x148] sm:$0xff]  ;;  %v736_v1 = vld [vmem:[%s2714_s8 + $0x1c0] sm:$0xff] }
  0xe7   :  { %554 = vmatprep.subr.mxu0 %v498_v4  ;;  %625 = vmatprep.subr.mxu1 %v500_v5  ;;  %v688_v2 = vld [vmem:[%s2714_s8 + $0x40] sm:$0xff]  ;;  %v703_v5 = vld [vmem:[%s2714_s8 + $0xb8] sm:$0xff] }
  0xe8   :  { %555 = vmatpush1.msra.mxu0 %v497_v6  ;;  %626 = vmatpush1.msra.mxu1 %v499_v7  ;;  %v720_v4 = vld [vmem:[%s2714_s8 + $0x140] sm:$0xff]  ;;  %v735_v6 = vld [vmem:[%s2714_s8 + $0x1b8] sm:$0xff] }
  0xe9   :  { %556 = vmatprep.subr.mxu0 %v494_v8  ;;  %627 = vmatprep.subr.mxu1 %v496_v9  ;;  %v687_v7 = vld [vmem:[%s2714_s8 + $0x38] sm:$0xff]  ;;  %v702_v9 = vld [vmem:[%s2714_s8 + $0xb0] sm:$0xff] }
  0xea   :  { %557 = vmatpush1.msra.mxu0 %v493_v10  ;;  %628 = vmatpush1.msra.mxu1 %v495_v11  ;;  %v719_v8 = vld [vmem:[%s2714_s8 + $0x138] sm:$0xff]  ;;  %v734_v10 = vld [vmem:[%s2714_s8 + $0x1b0] sm:$0xff] }
  0xeb   :  { %558 = vmatprep.subr.mxu0 %v490_v12  ;;  %629 = vmatprep.subr.mxu1 %v492_v13  ;;  %v686_v11 = vld [vmem:[%s2714_s8 + $0x30] sm:$0xff]  ;;  %v701_v13 = vld [vmem:[%s2714_s8 + $0xa8] sm:$0xff] }
  0xec   :  { %559 = vmatpush1.msra.mxu0 %v489_v14  ;;  %630 = vmatpush1.msra.mxu1 %v491_v15  ;;  %v718_v12 = vld [vmem:[%s2714_s8 + $0x130] sm:$0xff]  ;;  %v733_v14 = vld [vmem:[%s2714_s8 + $0x1a8] sm:$0xff] }
  0xed   :  { %560 = vmatprep.subr.mxu0 %v486_v16  ;;  %631 = vmatprep.subr.mxu1 %v488_v17  ;;  %v685_v15 = vld [vmem:[%s2714_s8 + $0x28] sm:$0xff]  ;;  %v700_v17 = vld [vmem:[%s2714_s8 + $0xa0] sm:$0xff] }
  0xee   :  { %561 = vmatpush1.msra.mxu0 %v485_v18  ;;  %632 = vmatpush1.msra.mxu1 %v487_v19  ;;  %v717_v16 = vld [vmem:[%s2714_s8 + $0x128] sm:$0xff]  ;;  %v732_v18 = vld [vmem:[%s2714_s8 + $0x1a0] sm:$0xff] }
  0xef   :  { %562 = vmatprep.subr.mxu0 %v482_v20  ;;  %633 = vmatprep.subr.mxu1 %v484_v21  ;;  %v684_v19 = vld [vmem:[%s2714_s8 + $0x20] sm:$0xff]  ;;  %v699_v21 = vld [vmem:[%s2714_s8 + $0x98] sm:$0xff] }
  0xf0   :  { %563 = vmatpush1.msra.mxu0 %v481_v22  ;;  %634 = vmatpush1.msra.mxu1 %v483_v23  ;;  %v716_v20 = vld [vmem:[%s2714_s8 + $0x120] sm:$0xff]  ;;  %v731_v22 = vld [vmem:[%s2714_s8 + $0x198] sm:$0xff] }
  0xf1   :  { %564 = vmatprep.subr.mxu0 %v478_v24  ;;  %635 = vmatprep.subr.mxu1 %v480_v25  ;;  %v683_v23 = vld [vmem:[%s2714_s8 + $0x18] sm:$0xff]  ;;  %v698_v25 = vld [vmem:[%s2714_s8 + $0x90] sm:$0xff] }
  0xf2   :  { %565 = vmatpush1.msra.mxu0 %v477_v26  ;;  %598 = vmatprep.mubr.f32.mxu0 %v1721_v3  ;;  %v715_v24 = vld [vmem:[%s2714_s8 + $0x118] sm:$0xff]  ;;  %v730_v26 = vld [vmem:[%s2714_s8 + $0x190] sm:$0xff] }
  0xf3   :  { %636 = vmatpush1.msra.mxu1 %v479_v27  ;;  %669 = vmatprep.mubr.f32.mxu1 %v1721_v3  ;;  %v682_v27 = vld [vmem:[%s2714_s8 + $0x10] sm:$0xff] }
  0xf4   :  { %1369 = vmatmul.mubr.msk.f32.vlgmr.msra.gmra.mxu0 %vm115_vm0, %v2234_v28  ;;  %1370 = vmatmul.mubr.msk.f32.vlgmr.msra.gmra.mxu1 %vm115_vm0, %v2234_v28 }
  0xf5   :  { %1449 = vmatprep.subr.mxu0 %v711_v29  ;;  %1484 = vmatprep.subr.mxu1 %v743_v30  ;;  %v714_v29 = vld [vmem:[%s2714_s8 + $0x110] sm:$0xff]  ;;  %v697_v30 = vld [vmem:[%s2714_s8 + $0x88] sm:$0xff] }
  0xf6   :  { %1450 = vmatpush3.msra.mxu0 %v695_v31  ;;  %1485 = vmatpush3.msra.mxu1 %v727_v32  ;;  %v729_v31 = vld [vmem:[%s2714_s8 + $0x188] sm:$0xff] }
  0xf7   :  { %1451 = vmatprep.subr.mxu0 %v710_v34  ;;  %1486 = vmatprep.subr.mxu1 %v742_v35  ;;  %v681_v32 = vld [vmem:[%s2714_s8 + $0x8] sm:$0xff]  ;;  %v696_v35 = vld [vmem:[%s2714_s8 + $0x80] sm:$0xff] }
  0xf8   :  { %1452 = vmatpush3.msra.mxu0 %v694_v36  ;;  %1487 = vmatpush3.msra.mxu1 %v726_v37  ;;  %v713_v34 = vld [vmem:[%s2714_s8 + $0x108] sm:$0xff]  ;;  %v728_v36 = vld [vmem:[%s2714_s8 + $0x180] sm:$0xff] }
  0xf9   :  { %1453 = vmatprep.subr.mxu0 %v709_v42  ;;  %1488 = vmatprep.subr.mxu1 %v741_v45  ;;  %v680_v37 = vld [vmem:[%s2714_s8] sm:$0xff] }
  0xfa   :  { %1454 = vmatpush3.msra.mxu0 %v693_v46  ;;  %1489 = vmatpush3.msra.mxu1 %v725_v47  ;;  %v712_v42 = vld [vmem:[%s2714_s8 + $0x100] sm:$0xff] }
  0xfb   :  { %1455 = vmatprep.subr.mxu0 %v708_v48  ;;  %1490 = vmatprep.subr.mxu1 %v740_v49  ;;  %v1368_v47 = vld [vmem:[%s2715_s5] ss:$0 sm:$0xff] }
  0xfc   :  { %1456 = vmatpush3.msra.mxu0 %v692_v50  ;;  %1491 = vmatpush3.msra.mxu1 %v724_v51 }
  0xfd   :  { %1457 = vmatprep.subr.mxu0 %v707_v52  ;;  %1492 = vmatprep.subr.mxu1 %v739_v53 }
  0xfe   :  { %1458 = vmatpush3.msra.mxu0 %v691_v54  ;;  %1493 = vmatpush3.msra.mxu1 %v723_v55  ;;  %v509_v54 = vld [vmem:[%s2716_s7] sm:$0xf] }
  0xff   :  { %1459 = vmatprep.subr.mxu0 %v706_v56  ;;  %1494 = vmatprep.subr.mxu1 %v738_v57  ;;  %v514_v55 = vrot.slane %v509_v54, %v97_v40  ;;  %v522_v56 = vrot.slane %v509_v54, %v105_v41  ;;  %v518_v57 = vrot.slane %v509_v54, %v101_v43  ;;  %v907_v41 = vld [vmem:[%s2717_s11 + $0x38] sm:$0xff]  ;;  %v906_v43 = vld [vmem:[%s2717_s11 + $0x30] sm:$0xff] }
 0x100   :  { %1460 = vmatpush3.msra.mxu0 %v690_v58  ;;  %1495 = vmatpush3.msra.mxu1 %v722_v59  ;;  %v526_v58 = vrot.slane %v509_v54, %v109_v44  ;;  %v898_v44 = vld [vmem:[%s2718_s10 + $0x30] sm:$0xff] }
 0x101   :  { %1461 = vmatprep.subr.mxu0 %v705_v60  ;;  %1496 = vmatprep.subr.mxu1 %v737_v61 }
 0x102   :  { %1462 = vmatpush3.msra.mxu0 %v689_v62  ;;  %1497 = vmatpush3.msra.mxu1 %v721_v63 }
 0x103   :  { %1463 = vmatprep.subr.mxu0 %v704_v0  ;;  %1498 = vmatprep.subr.mxu1 %v736_v1 }
 0x104   :  { %1464 = vmatpush3.msra.mxu0 %v688_v2  ;;  %1499 = vmatpush3.msra.mxu1 %v720_v4 }
 0x105   :  { %1465 = vmatprep.subr.mxu0 %v703_v5  ;;  %1500 = vmatprep.subr.mxu1 %v735_v6 }
 0x106   :  { %1466 = vmatpush3.msra.mxu0 %v687_v7  ;;  %1501 = vmatpush3.msra.mxu1 %v719_v8  ;;  %v905_v7 = vld [vmem:[%s2717_s11 + $0x28] sm:$0xff] }
 0x107   :  { %1467 = vmatprep.subr.mxu0 %v702_v9  ;;  %1502 = vmatprep.subr.mxu1 %v734_v10  ;;  %v897_v8 = vld [vmem:[%s2718_s10 + $0x28] sm:$0xff]  ;;  %v904_v9 = vld [vmem:[%s2717_s11 + $0x20] sm:$0xff] }
 0x108   :  { %1468 = vmatpush3.msra.mxu0 %v686_v11  ;;  %1503 = vmatpush3.msra.mxu1 %v718_v12  ;;  %v896_v10 = vld [vmem:[%s2718_s10 + $0x20] sm:$0xff]  ;;  %v903_v11 = vld [vmem:[%s2717_s11 + $0x18] sm:$0xff] }
 0x109   :  { %1469 = vmatprep.subr.mxu0 %v701_v13  ;;  %1504 = vmatprep.subr.mxu1 %v733_v14  ;;  %v895_v12 = vld [vmem:[%s2718_s10 + $0x18] sm:$0xff]  ;;  %v902_v13 = vld [vmem:[%s2717_s11 + $0x10] sm:$0xff] }
 0x10a   :  { %1470 = vmatpush3.msra.mxu0 %v685_v15  ;;  %1505 = vmatpush3.msra.mxu1 %v717_v16  ;;  %v894_v14 = vld [vmem:[%s2718_s10 + $0x10] sm:$0xff]  ;;  %v901_v15 = vld [vmem:[%s2717_s11 + $0x8] sm:$0xff] }
 0x10b   :  { %1471 = vmatprep.subr.mxu0 %v700_v17  ;;  %1506 = vmatprep.subr.mxu1 %v732_v18  ;;  %v893_v16 = vld [vmem:[%s2718_s10 + $0x8] sm:$0xff]  ;;  %v900_v17 = vld [vmem:[%s2717_s11] sm:$0xff] }
 0x10c   :  { %1472 = vmatpush3.msra.mxu0 %v684_v19  ;;  %1507 = vmatpush3.msra.mxu1 %v716_v20  ;;  %v892_v18 = vld [vmem:[%s2718_s10] sm:$0xff]  ;;  %v1073_v19 = vld [vmem:[%s2719_s12 + $0x38] sm:$0xff] }
 0x10d   :  { %1473 = vmatprep.subr.mxu0 %v699_v21  ;;  %1508 = vmatprep.subr.mxu1 %v731_v22  ;;  %v1070_v20 = vld [vmem:[%s2719_s12 + $0x20] sm:$0xff]  ;;  %v1069_v21 = vld [vmem:[%s2719_s12 + $0x18] sm:$0xff]  ;;  %v1068_v22 = vld [vmem:[%s2719_s12 + $0x10] sm:$0xff] }
 0x10e   :  { %1474 = vmatpush3.msra.mxu0 %v683_v23  ;;  %1509 = vmatpush3.msra.mxu1 %v715_v24  ;;  %v1067_v23 = vld [vmem:[%s2719_s12 + $0x8] sm:$0xff]  ;;  %v1066_v24 = vld [vmem:[%s2719_s12] sm:$0xff] }
 0x10f   :  { %1475 = vmatprep.subr.mxu0 %v698_v25  ;;  %1510 = vmatprep.subr.mxu1 %v730_v26 }
 0x110   :  { %1476 = vmatpush3.msra.mxu0 %v682_v27  ;;  %1511 = vmatpush3.msra.mxu1 %v714_v29 }
 0x111   :  { %1477 = vmatprep.subr.mxu0 %v697_v30  ;;  %1512 = vmatprep.subr.mxu1 %v729_v31 }
 0x112   :  { %1478 = vmatpush3.msra.mxu0 %v681_v32  ;;  %1513 = vmatpush3.msra.mxu1 %v713_v34 }
 0x113   :  { %1479 = vmatprep.subr.mxu0 %v696_v35  ;;  %1514 = vmatprep.subr.mxu1 %v728_v36 }
 0x114   :  { %1480 = vmatpush3.msra.mxu0 %v680_v37  ;;  %1515 = vmatpush3.msra.mxu1 %v712_v42  ;;  %v1371_v42 = vld [vmem:[%s2720_s9] ss:$0 sm:$0xff] }
 0x115   :  { %1580 = vmatprep.subr.mxu0 %v1721_v3  ;;  %1599 = vmatprep.subr.mxu1 %v1721_v3 }
 0x1a3   :  { %v1411_v45 = vpop.f32.mrf.mxu0  ;;  %v1446_v46 = vpop.f32.mrf.mxu1 }
 0x1a5   :  { %v1412_v48 = vpop.f32.mrf.mxu0  ;;  %v1447_v49 = vpop.f32.mrf.mxu1 }
 0x1a6   :  { %v1413_v50 = vadd.f32 %v1412_v48, %v1411_v45  ;;  %v1448_v51 = vadd.f32 %v1447_v49, %v1446_v46 }
 0x1a8   :  { %v403_v52 = vadd.f32 %v1413_v50, %v1368_v47 }
 0x1aa   :  { %v2439_v53 = vadd.f32 %v1448_v51, %v403_v52 }
 0x1b4   :  { %v600_v59 = vpop.f32.mrf.mxu0  ;;  %v671_v60 = vpop.f32.mrf.mxu1 }
 0x1b5   :  { %v601_v61 = vadd.f32 %v600_v59, %v514_v55  ;;  %v672_v62 = vadd.f32 %v671_v60, %v522_v56  ;;  %v1171_v60 = vld [vmem:[%s2721_s14 + $0x70] sm:$0xff] }
 0x1b6   :  { %v602_v63 = vpop.f32.mrf.mxu0  ;;  %v673_v0 = vpop.f32.mrf.mxu1 }
 0x1b7   :  { %v603_v1 = vadd.f32 %v602_v63, %v518_v57  ;;  %v674_v2 = vadd.f32 %v673_v0, %v526_v58  ;;  %v676_v40 = vmax.f32 %v601_v61, 0.0  ;;  %v678_v6 = vmax.f32 %v672_v62, 0.0  ;;  %v1170_v61 = vld [vmem:[%s2721_s14 + $0x68] sm:$0xff]  ;;  %v1169_v62 = vld [vmem:[%s2721_s14 + $0x60] sm:$0xff]  ;;  %v1168_v63 = vld [vmem:[%s2721_s14 + $0x58] sm:$0xff] }
 0x1b8   :  { %v1167_v0 = vld [vmem:[%s2721_s14 + $0x50] sm:$0xff] }
 0x1b9   :  { %v677_v4 = vmax.f32 %v603_v1, 0.0  ;;  %v679_v5 = vmax.f32 %v674_v2, 0.0  ;;  %v1166_v1 = vld [vmem:[%s2721_s14 + $0x48] sm:$0xff]  ;;  %v1165_v2 = vld [vmem:[%s2721_s14 + $0x40] sm:$0xff] }
 0x1bb   :  { %815 = vmatprep.mubr.f32.mxu0 %v677_v4  ;;  %885 = vmatprep.mubr.f32.mxu1 %v679_v5  ;;  %v1164_v4 = vld [vmem:[%s2721_s14 + $0x38] sm:$0xff]  ;;  %v1163_v5 = vld [vmem:[%s2721_s14 + $0x30] sm:$0xff] }
 0x1bc   :  { %816 = vmatmul.mubr.f32.vlgmr.msra.gmra.mxu0 %v676_v40  ;;  %886 = vmatmul.mubr.f32.vlgmr.msra.gmra.mxu1 %v678_v6  ;;  %v1162_v40 = vld [vmem:[%s2721_s14 + $0x28] sm:$0xff]  ;;  %v1161_v6 = vld [vmem:[%s2721_s14 + $0x20] sm:$0xff] }
 0x1bd   :  { %1581 = vmatpush3.msra.mxu0 %v907_v41  ;;  %1600 = vmatpush3.msra.mxu1 %v899_v39  ;;  %v1160_v41 = vld [vmem:[%s2721_s14 + $0x18] sm:$0xff]  ;;  %v1159_v39 = vld [vmem:[%s2721_s14 + $0x10] sm:$0xff] }
 0x1be   :  { %1582 = vmatprep.subr.mxu0 %v1721_v3  ;;  %1601 = vmatprep.subr.mxu1 %v1721_v3 }
 0x1bf   :  { %1583 = vmatpush3.msra.mxu0 %v906_v43  ;;  %1602 = vmatpush3.msra.mxu1 %v898_v44  ;;  %v1158_v43 = vld [vmem:[%s2721_s14 + $0x8] sm:$0xff]  ;;  %v1157_v44 = vld [vmem:[%s2721_s14] sm:$0xff] }
 0x1c0   :  { %1584 = vmatprep.subr.mxu0 %v1721_v3  ;;  %1603 = vmatprep.subr.mxu1 %v1721_v3 }
 0x1c1   :  { %1585 = vmatpush3.msra.mxu0 %v905_v7  ;;  %1604 = vmatpush3.msra.mxu1 %v897_v8  ;;  %v1268_v7 = vld [vmem:[%s2722_s16 + $0x78] sm:$0xff]  ;;  %v1267_v8 = vld [vmem:[%s2722_s16 + $0x70] sm:$0xff] }
 0x1c2   :  { %1586 = vmatprep.subr.mxu0 %v1721_v3  ;;  %1605 = vmatprep.subr.mxu1 %v1721_v3 }
 0x1c3   :  { %1587 = vmatpush3.msra.mxu0 %v904_v9  ;;  %1606 = vmatpush3.msra.mxu1 %v896_v10  ;;  %v1266_v9 = vld [vmem:[%s2722_s16 + $0x68] sm:$0xff]  ;;  %v1265_v10 = vld [vmem:[%s2722_s16 + $0x60] sm:$0xff] }
 0x1c4   :  { %1588 = vmatprep.subr.mxu0 %v1721_v3  ;;  %1607 = vmatprep.subr.mxu1 %v1721_v3 }
 0x1c5   :  { %1589 = vmatpush3.msra.mxu0 %v903_v11  ;;  %1608 = vmatpush3.msra.mxu1 %v895_v12  ;;  %v1264_v11 = vld [vmem:[%s2722_s16 + $0x58] sm:$0xff]  ;;  %v1263_v12 = vld [vmem:[%s2722_s16 + $0x50] sm:$0xff] }
 0x1c6   :  { %1590 = vmatprep.subr.mxu0 %v1721_v3  ;;  %1609 = vmatprep.subr.mxu1 %v1721_v3 }
 0x1c7   :  { %1591 = vmatpush3.msra.mxu0 %v902_v13  ;;  %1610 = vmatpush3.msra.mxu1 %v894_v14  ;;  %v1262_v13 = vld [vmem:[%s2722_s16 + $0x48] sm:$0xff]  ;;  %v1261_v14 = vld [vmem:[%s2722_s16 + $0x40] sm:$0xff] }
 0x1c8   :  { %1592 = vmatprep.subr.mxu0 %v1721_v3  ;;  %1611 = vmatprep.subr.mxu1 %v1721_v3 }
 0x1c9   :  { %1593 = vmatpush3.msra.mxu0 %v901_v15  ;;  %1612 = vmatpush3.msra.mxu1 %v893_v16  ;;  %v1260_v15 = vld [vmem:[%s2722_s16 + $0x38] sm:$0xff]  ;;  %v1259_v16 = vld [vmem:[%s2722_s16 + $0x30] sm:$0xff] }
 0x1ca   :  { %1594 = vmatprep.subr.mxu0 %v1721_v3  ;;  %1613 = vmatprep.subr.mxu1 %v1721_v3 }
 0x1cb   :  { %1595 = vmatpush3.msra.mxu0 %v900_v17  ;;  %1596 = vmatprep.mubr.msk.f32.mxu0 %vm1722_vm1, %v1721_v3  ;;  %v1258_v17 = vld [vmem:[%s2722_s16 + $0x28] sm:$0xff] }
 0x1cc   :  { %1614 = vmatpush3.msra.mxu1 %v892_v18  ;;  %1615 = vmatprep.mubr.msk.f32.mxu1 %vm1722_vm1, %v1721_v3  ;;  %v1257_v18 = vld [vmem:[%s2722_s16 + $0x20] sm:$0xff] }
 0x1cd   :  { %1597 = vmatmul.mubr.msk.f32.vlgmr.msra.gmra.mxu0 %vm115_vm0, %v2234_v28  ;;  %1616 = vmatmul.mubr.msk.f32.vlgmr.msra.gmra.mxu1 %vm115_vm0, %v1919_v33  ;;  %v1072_v28 = vld [vmem:[%s2719_s12 + $0x30] sm:$0xff]  ;;  %v1071_v33 = vld [vmem:[%s2719_s12 + $0x28] sm:$0xff] }
 0x1ce   :  { %1618 = vmatprep.subr.mxu0 %v1721_v3  ;;  %1634 = vmatprep.mubr.msk.f32.mxu0 %vm1722_vm1, %v1721_v3 }
 0x1cf   :  { %1637 = vmatprep.subr.mxu1 %v1721_v3  ;;  %1669 = vmatprep.mubr.msk.f32.mxu1 %vm1722_vm1, %v1721_v3 }
 0x1d0   :  { %1619 = vmatpush3.msra.mxu0 %v1073_v19  ;;  %v1256_v19 = vld [vmem:[%s2722_s16 + $0x18] sm:$0xff] }
 0x1d1   :  { %1620 = vmatprep.subr.mxu0 %v1721_v3 }
 0x1d2   :  { %1621 = vmatpush3.msra.mxu0 %v1072_v28  ;;  %v1375_v28 = vld [vmem:[%s2723_s13] ss:$0 sm:$0xff] }
 0x1d3   :  { %1622 = vmatprep.subr.mxu0 %v1721_v3 }
 0x1d4   :  { %1623 = vmatpush3.msra.mxu0 %v1071_v33 }
 0x1d5   :  { %1624 = vmatprep.subr.mxu0 %v1721_v3 }
 0x1d6   :  { %1625 = vmatpush3.msra.mxu0 %v1070_v20 }
 0x1d7   :  { %1626 = vmatprep.subr.mxu0 %v1721_v3 }
 0x1d8   :  { %1627 = vmatpush3.msra.mxu0 %v1069_v21 }
 0x1d9   :  { %1628 = vmatprep.subr.mxu0 %v1721_v3 }
 0x1da   :  { %1629 = vmatpush3.msra.mxu0 %v1068_v22 }
 0x1db   :  { %1630 = vmatprep.subr.mxu0 %v1721_v3 }
 0x1dc   :  { %1631 = vmatpush3.msra.mxu0 %v1067_v23 }
 0x1dd   :  { %1632 = vmatprep.subr.mxu0 %v1721_v3 }
 0x1de   :  { %1633 = vmatpush3.msra.mxu0 %v1066_v24  ;;  %v1255_v24 = vld [vmem:[%s2722_s16 + $0x10] sm:$0xff] }
 0x1df   :  { %1672 = vmatprep.subr.mxu0 %v1721_v3 }
 0x27c   :  { %v1481_v25 = vpop.f32.mrf.mxu0  ;;  %v1516_v26 = vpop.f32.mrf.mxu1 }
 0x27e   :  { %v1482_v27 = vpop.f32.mrf.mxu0  ;;  %v1517_v29 = vpop.f32.mrf.mxu1 }
 0x27f   :  { %v1483_v37 = vadd.f32 %v1482_v27, %v1481_v25  ;;  %v1518_v46 = vadd.f32 %v1517_v29, %v1516_v26  ;;  %v1254_v25 = vld [vmem:[%s2722_s16 + $0x8] sm:$0xff]  ;;  %v1253_v26 = vld [vmem:[%s2722_s16] sm:$0xff] }
 0x280   :  { %v1377_v27 = vld [vmem:[%s2724_s15] ss:$0 sm:$0xff] }
 0x281   :  { %v818_v45 = vadd.f32 %v1483_v37, %v1371_v42 }
 0x283   :  { %v888_v48 = vadd.f32 %v1518_v46, %v818_v45 }
 0x28d   :  { %v974_v30 = vpop.f32.mrf.mxu0  ;;  %v1044_v31 = vpop.f32.mrf.mxu1 }
 0x28e   :  { %v1045_v32 = vadd.f32 %v1044_v31, %v974_v30 }
 0x28f   :  { %v1598_v34 = vpop.f32.mrf.mxu0  ;;  %v1617_v35 = vpop.f32.mrf.mxu1 }
 0x290   :  { %v1374_v36 = vmul.f32 -1.442695, %v1045_v32  ;;  %v1378_v35 = vld [vmem:[%s2725_s17] ss:$0 sm:$0xff] }
 0x292   :  { %1709 = vpow2.f32 %v1374_v36 }
 0x29f   :  { %v1710_v47 = vpop.eup %1709 }
 0x2a0   :  { %v1051_v49 = vadd.f32 1.0, %v1710_v47 }
 0x2a2   :  { %1711 = vrcp.f32 %v1051_v49 }
 0x2a3   :  { %1713 = vtanh.f32 %v2439_v53  ;;  %v1172_v53 = vld [vmem:[%s2721_s14 + $0x78] sm:$0xff] }
 0x2a4   :  { %1715 = vtanh.f32 %v888_v48  ;;  %1638 = vmatpush3.msra.mxu1 %v1172_v53 }
 0x2a5   :  { %1639 = vmatprep.subr.mxu1 %v1721_v3 }
 0x2a6   :  { %1640 = vmatpush3.msra.mxu1 %v1171_v60 }
 0x2a7   :  { %1641 = vmatprep.subr.mxu1 %v1721_v3 }
 0x2a8   :  { %1642 = vmatpush3.msra.mxu1 %v1170_v61 }
 0x2a9   :  { %1643 = vmatprep.subr.mxu1 %v1721_v3 }
 0x2aa   :  { %1644 = vmatpush3.msra.mxu1 %v1169_v62 }
 0x2ab   :  { %1645 = vmatprep.subr.mxu1 %v1721_v3 }
 0x2ac   :  { %1646 = vmatpush3.msra.mxu1 %v1168_v63 }
 0x2ad   :  { %1647 = vmatprep.subr.mxu1 %v1721_v3 }
 0x2ae   :  { %1648 = vmatpush3.msra.mxu1 %v1167_v0 }
 0x2af   :  { %v1712_v50 = vpop.eup %1711  ;;  %1649 = vmatprep.subr.mxu1 %v1721_v3 }
 0x2b0   :  { %v1714_v51 = vpop.eup %1713  ;;  %vm1058_vm2 = vcmp.gt.f32.partialorder %v1712_v50, 0.5  ;;  %v1055_v52 = vsub.f32 1.0, %v1712_v50  ;;  %1650 = vmatpush3.msra.mxu1 %v1166_v1 }
 0x2b1   :  { %v1716_v54 = vpop.eup %1715  ;;  %v1059_v55 = vsel %vm1058_vm2, 1.0, %v1721_v3  ;;  %v1054_v57 = vmul.f32 %v1714_v51, %v1712_v50  ;;  %1651 = vmatprep.subr.mxu1 %v1721_v3  ;;  %v1356_v50 = vand.u32 127, %v95_v38 }
 0x2b2   :  { %v1060_v56 = vsel %vm115_vm0, %v1059_v55, 0.0  ;;  %v1056_v58 = vmul.f32 %v1716_v54, %v1055_v52  ;;  %1652 = vmatpush3.msra.mxu1 %v1165_v2 }
 0x2b3   :  { %1061 = vadd.xlane.f32.xlu1 %v1060_v56  ;;  %1653 = vmatprep.subr.mxu1 %v1721_v3  ;;  %vm1358_vm5 = vcmp.eq.s32.totalorder %v1356_v50, 127  ;;  %vm1357_vm6 = vcmp.eq.s32.totalorder %v1356_v50, 126 }
 0x2b4   :  { %v1057_v59 = vadd.f32 %v1056_v58, %v1054_v57  ;;  %1654 = vmatpush3.msra.mxu1 %v1164_v4 }
 0x2b5   :  { %1655 = vmatprep.subr.mxu1 %v1721_v3 }
 0x2b6   :  { %1635 = vmatmul.mubr.msk.f32.vlgmr.msra.gmra.mxu0 %vm115_vm0, %v1057_v59  ;;  %1656 = vmatpush3.msra.mxu1 %v1163_v5 }
 0x2b7   :  { %1704 = vmatprep.mubr.msk.f32.mxu0 %vm1722_vm1, %v1721_v3  ;;  %1657 = vmatprep.subr.mxu1 %v1721_v3 }
 0x2b8   :  { %1658 = vmatpush3.msra.mxu1 %v1162_v40  ;;  %1673 = vmatpush3.msra.mxu0 %v1268_v7 }
 0x2b9   :  { %1659 = vmatprep.subr.mxu1 %v1721_v3  ;;  %1674 = vmatprep.subr.mxu0 %v1721_v3 }
 0x2ba   :  { %1660 = vmatpush3.msra.mxu1 %v1161_v6  ;;  %1675 = vmatpush3.msra.mxu0 %v1267_v8 }
 0x2bb   :  { %1661 = vmatprep.subr.mxu1 %v1721_v3  ;;  %1676 = vmatprep.subr.mxu0 %v1721_v3 }
 0x2bc   :  { %1662 = vmatpush3.msra.mxu1 %v1160_v41  ;;  %1677 = vmatpush3.msra.mxu0 %v1266_v9 }
 0x2bd   :  { %1663 = vmatprep.subr.mxu1 %v1721_v3  ;;  %1678 = vmatprep.subr.mxu0 %v1721_v3 }
 0x2be   :  { %1664 = vmatpush3.msra.mxu1 %v1159_v39  ;;  %1679 = vmatpush3.msra.mxu0 %v1265_v10 }
 0x2bf   :  { %1665 = vmatprep.subr.mxu1 %v1721_v3  ;;  %1680 = vmatprep.subr.mxu0 %v1721_v3 }
 0x2c0   :  { %1666 = vmatpush3.msra.mxu1 %v1158_v43  ;;  %1681 = vmatpush3.msra.mxu0 %v1264_v11 }
 0x2c1   :  { %1667 = vmatprep.subr.mxu1 %v1721_v3  ;;  %1682 = vmatprep.subr.mxu0 %v1721_v3 }
 0x2c2   :  { %1668 = vmatpush3.msra.mxu1 %v1157_v44  ;;  %1683 = vmatpush3.msra.mxu0 %v1263_v12 }
 0x2c3   :  { %1684 = vmatprep.subr.mxu0 %v1721_v3 }
 0x2c4   :  { %1685 = vmatpush3.msra.mxu0 %v1262_v13 }
 0x2c5   :  { %1686 = vmatprep.subr.mxu0 %v1721_v3 }
 0x2c6   :  { %1687 = vmatpush3.msra.mxu0 %v1261_v14 }
 0x2c7   :  { %1688 = vmatprep.subr.mxu0 %v1721_v3 }
 0x2c8   :  { %1689 = vmatpush3.msra.mxu0 %v1260_v15 }
 0x2c9   :  { %1690 = vmatprep.subr.mxu0 %v1721_v3 }
 0x2ca   :  { %1691 = vmatpush3.msra.mxu0 %v1259_v16 }
 0x2cb   :  { %1692 = vmatprep.subr.mxu0 %v1721_v3 }
 0x2cc   :  { %1693 = vmatpush3.msra.mxu0 %v1258_v17 }
 0x2cd   :  { %1694 = vmatprep.subr.mxu0 %v1721_v3 }
 0x2ce   :  { %1695 = vmatpush3.msra.mxu0 %v1257_v18 }
 0x2cf   :  { %1696 = vmatprep.subr.mxu0 %v1721_v3 }
 0x2d0   :  { %1697 = vmatpush3.msra.mxu0 %v1256_v19 }
 0x2d1   :  { %1698 = vmatprep.subr.mxu0 %v1721_v3 }
 0x2d2   :  { %1699 = vmatpush3.msra.mxu0 %v1255_v24 }
 0x2d3   :  { %1700 = vmatprep.subr.mxu0 %v1721_v3 }
 0x2d4   :  { %1701 = vmatpush3.msra.mxu0 %v1254_v25 }
 0x2d5   :  { %1702 = vmatprep.subr.mxu0 %v1721_v3 }
 0x2d6   :  { %1703 = vmatpush3.msra.mxu0 %v1253_v26 }
 0x33c   :  { %v1062_v49 = vpop.xlane.xlu1 %1061 }
 0x33d   :  { %v1064_v51 = vsub.f32 64.0, %v1062_v49  ;;  %v1063_v56 = vmul.f32 1.5625, %v1062_v49 }
 0x33f   :  { %v1065_v54 = vmul.f32 1.5625, %v1064_v51 }
 0x376   :  { %v1150_v33 = vpop.f32.mrf.mxu0 }
 0x377   :  { %v1151_v20 = vadd.f32 %v1375_v28, %v1150_v33 }
 0x378   :  { %v1636_v21 = vpop.f32.mrf.mxu0 }
 0x379   :  { %vm1154_vm3 = vcmp.ge.f32.partialorder %v1151_v20, 0.0  ;;  %v1155_v22 = vmul.f32 0.01, %v1151_v20 }
 0x37b   :  { %v1156_v23 = vsel %vm1154_vm3, %v1151_v20, %v1155_v22 }
 0x37c   :  { %1670 = vmatmul.mubr.f32.vlgmr.msra.gmra.mxu1 %v1156_v23 }
 0x43c   :  { %v1246_v29 = vpop.f32.mrf.mxu1 }
 0x43d   :  { %v1247_v30 = vadd.f32 %v1377_v27, %v1246_v29 }
 0x43e   :  { %v1671_v31 = vpop.f32.mrf.mxu1 }
 0x43f   :  { %vm1250_vm4 = vcmp.ge.f32.partialorder %v1247_v30, 0.0  ;;  %v1251_v32 = vmul.f32 0.01, %v1247_v30 }
 0x441   :  { %v1252_v34 = vsel %vm1250_vm4, %v1247_v30, %v1251_v32 }
 0x442   :  { %1705 = vmatmul.mubr.f32.vlgmr.msra.gmra.mxu0 %v1252_v34 }
 0x502   :  { %v1342_v36 = vpop.f32.mrf.mxu0 }
 0x503   :  { %v1343_v37 = vadd.f32 %v1378_v35, %v1342_v36 }
 0x504   :  { %v1706_v42 = vpop.f32.mrf.mxu0 }
 0x505   :  { %1346 = vmax.xlane.f32.xlu0 %v1343_v37 }
 0x58e   :  { %v1347_v3 = vpop.xlane.xlu0 %1346 }
 0x58f   :  { %v1348_v45 = vsub.f32 %v1343_v37, %v1347_v3 }
 0x591   :  { %v1349_v46 = vmul.f32 1.442695, %v1348_v45 }
 0x593   :  { %1717 = vpow2.f32 %v1349_v46 }
 0x5a0   :  { %v1718_v47 = vpop.eup %1717 }
 0x5a1   :  { %1351 = vadd.xlane.f32.xlu0 %v1718_v47 }
 0x62a   :  { %v1352_v48 = vpop.xlane.xlu0 %1351 }
 0x62b   :  { %1719 = vrcp.f32 %v1352_v48 }
 0x638   :  { %v1720_v52 = vpop.eup %1719 }
 0x639   :  { %v1354_v55 = vmul.f32 %v1720_v52, %v1718_v47 }
 0x63b   :  { %v1359_v57 = vsel %vm1358_vm5, %v1065_v54, %v1354_v55 }
 0x63c   :  { %v1360_v58 = vsel %vm1357_vm6, %v1063_v56, %v1359_v57 }
 0x63d   :  { %1361 = vst [vmem:[%s2726_s18] sm:$0xff] %v1360_v58 }

</bundles_post_ra>
